<compile_context>
chip_gen: v7x
topology: tpu7x:2x2x1
jax: 0.10.0
libtpu: 0.0.40
codegen_flags: <defaults>
</compile_context>

<pallas_src>
import jax
import jax.numpy as jnp
from jax import lax
from jax.experimental import pallas as pl
from jax.experimental.pallas import tpu as pltpu

GATE_BIAS = 0.0
LN_EPS = 1e-5  # torch.nn.LayerNorm default


def _dgru_block_kernel(xs_ref, h0_ref,
                       wW_ref, bW_ref,
                       wU_ref, bU_ref,
                       lng_ref, lnb_ref,
                       ln2g_ref, ln2b_ref,
                       o_ref,
                       h_carry):
    """Tb DGRU recurrence steps per grid iteration. Weights stay VMEM-resident."""
    blk = pl.program_id(0)

    @pl.when(blk == 0)
    def _():
        h_carry[...] = h0_ref[...].astype(jnp.float32)

    B, D = h_carry.shape
    Tb = xs_ref.shape[0]
    inv_width = 1.0 / (2 * D)

    # ---- Hoist resident-parameter loads + broadcasts out of the time loop ----
    wW = wW_ref[...]                                          # (2D, 5D) bf16
    wU = wU_ref[...]                                          # (2D, D)  bf16
    bW = jnp.broadcast_to(bW_ref[...], (B, 5 * D))            # f32 rows -> (B, F)
    bU = jnp.broadcast_to(bU_ref[...], (B, D))
    lng = jnp.broadcast_to(lng_ref[...], (B, 2 * D))
    lnb = jnp.broadcast_to(lnb_ref[...], (B, 2 * D))
    ln2g = jnp.broadcast_to(ln2g_ref[...], (B, 2 * D))
    ln2b = jnp.broadcast_to(ln2b_ref[...], (B, 2 * D))

    def ln_fused(v, g, b):
        # Single-pass LayerNorm: sum and sum-of-squares together,
        # var = E[x^2] - mean^2 (halves the cross-lane reduction passes).
        s = jnp.sum(v, axis=-1, keepdims=True)
        ss = jnp.sum(v * v, axis=-1, keepdims=True)
        mu = s * inv_width
        var = ss * inv_width - mu * mu
        return (v - mu) * lax.rsqrt(var + LN_EPS) * g + b

    def step(i, h):
        x = xs_ref[i].astype(jnp.float32)          # (B, D)

        # Raw [x | h] slab, reused for LN1 input and (gated) LN2 input.
        xh = jnp.concatenate([x, h], axis=1)       # (B, 2D)

        # inp = LayerNorm(xh) * dropout_mask (mask folded into gamma/beta; eval mode)
        inp = ln_fused(xh, lng, lnb)

        # gates = gateW(inp) : (B, 5D) — bf16 MXU matmul, f32 accumulation
        gates = jnp.dot(inp.astype(jnp.bfloat16), wW,
                        preferred_element_type=jnp.float32) + bW

        # First 2D lanes are [rx | rh] in the same lane order as [x | h]:
        #   cat([x*rx, h*rh], 1) == xh * sigmoid(gates[:, :2D])
        r = jax.nn.sigmoid(gates[:, :2 * D])       # (B, 2D)
        z0 = gates[:, 2 * D:3 * D]
        z1 = gates[:, 3 * D:4 * D]
        z2 = gates[:, 4 * D:5 * D]
        if GATE_BIAS != 0.0:                       # dead subtract elided at trace time
            z2 = z2 - GATE_BIAS

        # softmax over stacked (z0, z1, z2), elementwise over (B, D)
        m = jnp.maximum(jnp.maximum(z0, z1), z2)
        e0 = jnp.exp(z0 - m)
        e1 = jnp.exp(z1 - m)
        e2 = jnp.exp(z2 - m)
        denom = e0 + e1 + e2                       # exact divide below (no drift)

        # inp2 = LayerNorm(xh * [rx|rh]) * dropout_mask
        inp2 = ln_fused(xh * r, ln2g, ln2b)

        # u = tanh(gateU(inp2)) : (B, D)
        u = jnp.tanh(jnp.dot(inp2.astype(jnp.bfloat16), wU,
                             preferred_element_type=jnp.float32) + bU)

        # h_new = softmax-normalized convex combination of (x, h, u)
        h_new = (x * e0 + h * e1 + u * e2) / denom
        o_ref[i] = h_new.astype(o_ref.dtype)
        return h_new

    # Unrolled inner loop over the Tb timesteps of this block (LLO visibility);
    # the hidden state is the loop carry and persists across blocks via scratch.
    h_final = lax.fori_loop(0, Tb, step, h_carry[...], unroll=True)
    h_carry[...] = h_final


def dgru_sequence(xs, h0, params, *, time_block=8):
    """Run the DGRU cell over a whole sequence inside one pallas_call.

    xs: (T, B, D) per-step inputs; h0: (B, D) initial state.
    Returns hs: (T, B, D), the hidden state after every step (hs[-1] == final h).
    """
    T, B, D = xs.shape
    wW, bW, wU, bU, lng, lnb, ln2g, ln2b, mask = params

    tb = max(1, min(time_block, T))
    n_blk = pl.cdiv(T, tb)
    T_pad = n_blk * tb
    # Pad time at the end; padded steps run after all real steps and are sliced off.
    xs_in = xs if T_pad == T else jnp.pad(xs, ((0, T_pad - T), (0, 0), (0, 0)))

    row = lambda v: v.reshape(1, -1)
    # Fold the constant (eval-mode) dropout mask into the LayerNorm affine.
    args = (
        xs_in,
        h0,
        wW.astype(jnp.bfloat16),
        row(bW).astype(jnp.float32),
        wU.astype(jnp.bfloat16),
        row(bU).astype(jnp.float32),
        row(lng * mask).astype(jnp.float32),
        row(lnb * mask).astype(jnp.float32),
        row(ln2g * mask).astype(jnp.float32),
        row(ln2b * mask).astype(jnp.float32),
    )

    # Weights / params: constant index_map -> DMA'd once, resident in VMEM.
    # TODO(synk): for very large D on v7x (64 MiB VMEM) give these specs
    # pipeline_mode=pl.Buffered(1) to avoid double-buffering the weights.
    resident = lambda a: pl.BlockSpec(a.shape, lambda t: (0,) * a.ndim)
    in_specs = [pl.BlockSpec((tb, B, D), lambda t: (t, 0, 0))]   # xs: time block t
    in_specs += [resident(a) for a in args[1:]]

    grid_spec = pltpu.PrefetchScalarGridSpec(
        num_scalar_prefetch=0,
        grid=(n_blk,),
        in_specs=in_specs,
        out_specs=pl.BlockSpec((tb, B, D), lambda t: (t, 0, 0)),
        scratch_shapes=[pltpu.VMEM((B, D), jnp.float32)],        # hidden-state carry
    )

    hs = pl.pallas_call(
        _dgru_block_kernel,
        out_shape=jax.ShapeDtypeStruct((T_pad, B, D), xs.dtype),
        grid_spec=grid_spec,
        compiler_params=pltpu.CompilerParams(
            dimension_semantics=("arbitrary",),                  # recurrence axis
            vmem_limit_bytes=32 * 1024 * 1024,                   # safe on v5e/v6e/v7x
        ),
    )(*args)
    return hs[:T]


def dgru_cell(x, h, params):
    """Single-step forward, matching DGRUCell.forward(x, h) (eval mode)."""
    return dgru_sequence(x[None], h, params, time_block=1)[0]


# ----------------------------- pure-JAX reference -----------------------------
def dgru_reference_step(x, h, params):
    wW, bW, wU, bU, lng, lnb, ln2g, ln2b, mask = params

    def ln(v, g, b):
        mu = jnp.mean(v, -1, keepdims=True)
        var = jnp.mean((v - mu) ** 2, -1, keepdims=True)
        return (v - mu) / jnp.sqrt(var + LN_EPS) * g + b

    inp = ln(jnp.concatenate([x, h], 1), lng, lnb) * mask[None, :]
    gates = inp @ wW + bW
    D = x.shape[1]
    g = [gates[:, i * D:(i + 1) * D] for i in range(5)]
    rx, rh = jax.nn.sigmoid(g[0]), jax.nn.sigmoid(g[1])
    zg = jnp.stack([g[2], g[3], g[4] - GATE_BIAS], -1)
    z = jax.nn.softmax(zg, -1)
    inp2 = ln(jnp.concatenate([x * rx, h * rh], 1), ln2g, ln2b) * mask[None, :]
    u = jnp.tanh(inp2 @ wU + bU)
    return jnp.sum(jnp.stack([x, h, u], 2) * z, -1)


def dgru_reference_sequence(xs, h0, params):
    def step(h, x):
        h_new = dgru_reference_step(x, h, params)
        return h_new, h_new
    _, hs = lax.scan(step, h0, xs)
    return hs


if __name__ == "__main__":
    # D multiple of 128 -> lane-aligned gate slices / stores;
    # B=64 raises MXU row utilization (recurrence serializes only over T);
    # T=16 with time_block=8 -> two grid iterations, 8 unrolled steps each.
    T, B, D = 16, 64, 128
    key = jax.random.PRNGKey(0)
    ks = jax.random.split(key, 11)

    xs = jax.random.normal(ks[0], (T, B, D), jnp.float32)
    h0 = jax.random.normal(ks[1], (B, D), jnp.float32)

    # deterministic synthetic parameters (shapes per DGRUCell.__init__, transposed)
    wW = jax.random.normal(ks[2], (2 * D, 5 * D), jnp.float32) * 0.05   # gateW.weight^T
    bW = jax.random.normal(ks[3], (5 * D,), jnp.float32) * 0.05
    wU = jax.random.normal(ks[4], (2 * D, D), jnp.float32) * 0.05       # gateU.weight^T
    bU = jax.random.normal(ks[5], (D,), jnp.float32) * 0.05
    lng = 1.0 + 0.1 * jax.random.normal(ks[6], (2 * D,), jnp.float32)   # ln.weight
    lnb = 0.1 * jax.random.normal(ks[7], (2 * D,), jnp.float32)         # ln.bias
    ln2g = 1.0 + 0.1 * jax.random.normal(ks[8], (2 * D,), jnp.float32)  # ln2.weight
    ln2b = 0.1 * jax.random.normal(ks[9], (2 * D,), jnp.float32)        # ln2.bias
    # dropout_mask buffer (ones in the module; non-trivial here to exercise folding)
    mask = (jax.random.uniform(ks[10], (2 * D,)) < 0.8).astype(jnp.float32)

    params = (wW, bW, wU, bU, lng, lnb, ln2g, ln2b, mask)

    # Tolerances account for the bf16 MXU matmuls (elementwise/LN/softmax stay f32).
    TOL = dict(atol=5e-2, rtol=5e-2)

    # single step (matches DGRUCell.forward semantics)
    out1 = jax.block_until_ready(dgru_cell(xs[0], h0, params))
    ref1 = dgru_reference_step(xs[0], h0, params)
    assert out1.shape == (B, D)
    assert jnp.allclose(out1, ref1, **TOL), "single-step mismatch vs reference"

    # full recurrence: Tb-blocked grid, unrolled inner loop, resident weights
    out_seq = jax.block_until_ready(dgru_sequence(xs, h0, params, time_block=8))
    ref_seq = dgru_reference_sequence(xs, h0, params)
    assert out_seq.shape == (T, B, D)
    assert jnp.allclose(out_seq, ref_seq, **TOL), "sequence mismatch vs reference"

    # TODO(synk): training-mode stochastic dropout is not implemented (eval-mode identity).
    print("KERNEL_OK")
</pallas_src>

<mosaic_0001>
module attributes {stable_mosaic.version = 11 : i64} {
  func.func @_dgru_block_kernel(%arg0: i32, %arg1: memref<1x64x128xf32, #tpu.memory_space<vmem>>, %arg2: memref<64x128xf32, #tpu.memory_space<vmem>>, %arg3: memref<256x640xbf16, #tpu.memory_space<vmem>>, %arg4: memref<1x640xf32, #tpu.memory_space<vmem>>, %arg5: memref<256x128xbf16, #tpu.memory_space<vmem>>, %arg6: memref<1x128xf32, #tpu.memory_space<vmem>>, %arg7: memref<1x256xf32, #tpu.memory_space<vmem>>, %arg8: memref<1x256xf32, #tpu.memory_space<vmem>>, %arg9: memref<1x256xf32, #tpu.memory_space<vmem>>, %arg10: memref<1x256xf32, #tpu.memory_space<vmem>>, %arg11: memref<1x64x128xf32, #tpu.memory_space<vmem>>, %arg12: memref<64x128xf32, #tpu.memory_space<vmem>>) attributes {dimension_semantics = [#tpu.dimension_semantics<arbitrary>], iteration_bounds = array<i64: 1>, scalar_prefetch = 0 : i64, scratch_operands = 1 : i64, tpu.core_type = #tpu.core_type<tc>, window_params = [{transform_indices = @transform_0, window_bounds = array<i64: 1, 64, 128>}, {pipeline_mode = #tpu.pipeline_mode<synchronous>, transform_indices = @transform_1, window_bounds = array<i64: 64, 128>}, {pipeline_mode = #tpu.pipeline_mode<synchronous>, transform_indices = @transform_2, window_bounds = array<i64: 256, 640>}, {pipeline_mode = #tpu.pipeline_mode<synchronous>, transform_indices = @transform_3, window_bounds = array<i64: 1, 640>}, {pipeline_mode = #tpu.pipeline_mode<synchronous>, transform_indices = @transform_4, window_bounds = array<i64: 256, 128>}, {pipeline_mode = #tpu.pipeline_mode<synchronous>, transform_indices = @transform_5, window_bounds = array<i64: 1, 128>}, {pipeline_mode = #tpu.pipeline_mode<synchronous>, transform_indices = @transform_6, window_bounds = array<i64: 1, 256>}, {pipeline_mode = #tpu.pipeline_mode<synchronous>, transform_indices = @transform_7, window_bounds = array<i64: 1, 256>}, {pipeline_mode = #tpu.pipeline_mode<synchronous>, transform_indices = @transform_8, window_bounds = array<i64: 1, 256>}, {pipeline_mode = #tpu.pipeline_mode<synchronous>, transform_indices = @transform_9, window_bounds = array<i64: 1, 256>}, {transform_indices = @transform_10, window_bounds = array<i64: 1, 64, 128>}]} {
    %c0_i32 = arith.constant 0 : i32
    %0 = arith.cmpi eq, %arg0, %c0_i32 : i32
    %1 = arith.extui %0 : i1 to i32
    %c0_i32_0 = arith.constant 0 : i32
    %2 = arith.cmpi ne, %1, %c0_i32_0 : i32
    scf.if %2 {
      %c0_37 = arith.constant 0 : index
      %c0_38 = arith.constant 0 : index
      %106 = vector.load %arg2[%c0_37, %c0_38] : memref<64x128xf32, #tpu.memory_space<vmem>>, vector<64x128xf32>
      %c0_39 = arith.constant 0 : index
      %c0_40 = arith.constant 0 : index
      %107 = vector.load %arg12[%c0_39, %c0_40] : memref<64x128xf32, #tpu.memory_space<vmem>>, vector<64x128xf32>
      tpu.vector_store %arg12[%c0_39, %c0_40], %106 {strides = array<i32>} : memref<64x128xf32, #tpu.memory_space<vmem>>, vector<64x128xf32>,
    } else {
    }
    %c0 = arith.constant 0 : index
    %c0_1 = arith.constant 0 : index
    %3 = vector.load %arg3[%c0, %c0_1] : memref<256x640xbf16, #tpu.memory_space<vmem>>, vector<256x640xbf16>
    %c0_2 = arith.constant 0 : index
    %c0_3 = arith.constant 0 : index
    %4 = vector.load %arg5[%c0_2, %c0_3] : memref<256x128xbf16, #tpu.memory_space<vmem>>, vector<256x128xbf16>
    %c0_4 = arith.constant 0 : index
    %c0_5 = arith.constant 0 : index
    %5 = vector.load %arg4[%c0_4, %c0_5] : memref<1x640xf32, #tpu.memory_space<vmem>>, vector<1x640xf32>
    %6 = vector.shape_cast %5 : vector<1x640xf32> to vector<1x640xf32>
    %7 = vector.broadcast %6 : vector<1x640xf32> to vector<64x640xf32>
    %c0_6 = arith.constant 0 : index
    %c0_7 = arith.constant 0 : index
    %8 = vector.load %arg6[%c0_6, %c0_7] : memref<1x128xf32, #tpu.memory_space<vmem>>, vector<1x128xf32>
    %9 = vector.shape_cast %8 : vector<1x128xf32> to vector<1x128xf32>
    %10 = vector.broadcast %9 : vector<1x128xf32> to vector<64x128xf32>
    %c0_8 = arith.constant 0 : index
    %c0_9 = arith.constant 0 : index
    %11 = vector.load %arg7[%c0_8, %c0_9] : memref<1x256xf32, #tpu.memory_space<vmem>>, vector<1x256xf32>
    %12 = vector.shape_cast %11 : vector<1x256xf32> to vector<1x256xf32>
    %13 = vector.broadcast %12 : vector<1x256xf32> to vector<64x256xf32>
    %c0_10 = arith.constant 0 : index
    %c0_11 = arith.constant 0 : index
    %14 = vector.load %arg8[%c0_10, %c0_11] : memref<1x256xf32, #tpu.memory_space<vmem>>, vector<1x256xf32>
    %15 = vector.shape_cast %14 : vector<1x256xf32> to vector<1x256xf32>
    %16 = vector.broadcast %15 : vector<1x256xf32> to vector<64x256xf32>
    %c0_12 = arith.constant 0 : index
    %c0_13 = arith.constant 0 : index
    %17 = vector.load %arg9[%c0_12, %c0_13] : memref<1x256xf32, #tpu.memory_space<vmem>>, vector<1x256xf32>
    %18 = vector.shape_cast %17 : vector<1x256xf32> to vector<1x256xf32>
    %19 = vector.broadcast %18 : vector<1x256xf32> to vector<64x256xf32>
    %c0_14 = arith.constant 0 : index
    %c0_15 = arith.constant 0 : index
    %20 = vector.load %arg10[%c0_14, %c0_15] : memref<1x256xf32, #tpu.memory_space<vmem>>, vector<1x256xf32>
    %21 = vector.shape_cast %20 : vector<1x256xf32> to vector<1x256xf32>
    %22 = vector.broadcast %21 : vector<1x256xf32> to vector<64x256xf32>
    %c0_16 = arith.constant 0 : index
    %c0_17 = arith.constant 0 : index
    %23 = vector.load %arg12[%c0_16, %c0_17] : memref<64x128xf32, #tpu.memory_space<vmem>>, vector<64x128xf32>
    %c0_i32_18 = arith.constant 0 : i32
    %24 = arith.index_cast %c0_i32_18 : i32 to index
    %c0_19 = arith.constant 0 : index
    %c0_20 = arith.constant 0 : index
    %25 = vector.load %arg1[%24, %c0_19, %c0_20] : memref<1x64x128xf32, #tpu.memory_space<vmem>>, vector<1x64x128xf32>
    %26 = vector.shape_cast %25 : vector<1x64x128xf32> to vector<64x128xf32>
    %27 = tpu.concatenate %26, %23 in 1 : vector<64x128xf32>, vector<64x128xf32> -> vector<64x256xf32>
    %cst = arith.constant dense<0.000000e+00> : vector<64xf32>
    %28 = vector.multi_reduction <add>, %27, %cst [1] : vector<64x256xf32> to vector<64xf32>
    %29 = vector.shape_cast %28 : vector<64xf32> to vector<64x1xf32>
    %30 = arith.mulf %27, %27 : vector<64x256xf32>
    %cst_21 = arith.constant dense<0.000000e+00> : vector<64xf32>
    %31 = vector.multi_reduction <add>, %30, %cst_21 [1] : vector<64x256xf32> to vector<64xf32>
    %32 = vector.shape_cast %31 : vector<64xf32> to vector<64x1xf32>
    %cst_22 = arith.constant 3.906250e-03 : f32
    %33 = vector.broadcast %cst_22 : f32 to vector<64x1xf32>
    %34 = arith.mulf %29, %33 : vector<64x1xf32>
    %cst_23 = arith.constant 3.906250e-03 : f32
    %35 = vector.broadcast %cst_23 : f32 to vector<64x1xf32>
    %36 = arith.mulf %32, %35 : vector<64x1xf32>
    %37 = arith.mulf %34, %34 : vector<64x1xf32>
    %38 = arith.subf %36, %37 : vector<64x1xf32>
    %39 = vector.broadcast %34 : vector<64x1xf32> to vector<64x256xf32>
    %40 = arith.subf %27, %39 : vector<64x256xf32>
    %cst_24 = arith.constant 9.99999974E-6 : f32
    %41 = vector.broadcast %cst_24 : f32 to vector<64x1xf32>
    %42 = arith.addf %38, %41 : vector<64x1xf32>
    %43 = math.rsqrt %42 : vector<64x1xf32>
    %44 = vector.broadcast %43 : vector<64x1xf32> to vector<64x256xf32>
    %45 = arith.mulf %40, %44 : vector<64x256xf32>
    %46 = arith.mulf %45, %13 : vector<64x256xf32>
    %47 = arith.addf %46, %16 : vector<64x256xf32>
    %48 = arith.truncf %47 : vector<64x256xf32> to vector<64x256xbf16>
    %cst_25 = arith.constant dense<0.000000e+00> : vector<64x640xf32>
    %49 = tpu.matmul %48, %3, %cst_25 {dimension_numbers = #tpu.dot_dimension_numbers<[1], [0], [0], [1], [0, 0, 1, 1], [], []>} : vector<64x256xbf16>, vector<256x640xbf16>, vector<64x640xf32> -> vector<64x640xf32>
    %50 = arith.addf %49, %7 : vector<64x640xf32>
    %51 = vector.extract_strided_slice %50 {offsets = [0, 0], sizes = [64, 256], strides = [1, 1]} : vector<64x640xf32> to vector<64x256xf32>
    %52 = arith.negf %51 : vector<64x256xf32>
    %53 = math.exp %52 : vector<64x256xf32>
    %cst_26 = arith.constant 1.000000e+00 : f32
    %54 = vector.broadcast %cst_26 : f32 to vector<64x256xf32>
    %55 = arith.addf %54, %53 : vector<64x256xf32>
    %56 = arith.divf %54, %55 : vector<64x256xf32>
    %57 = vector.extract_strided_slice %50 {offsets = [0, 256], sizes = [64, 128], strides = [1, 1]} : vector<64x640xf32> to vector<64x128xf32>
    %58 = vector.extract_strided_slice %50 {offsets = [0, 384], sizes = [64, 128], strides = [1, 1]} : vector<64x640xf32> to vector<64x128xf32>
    %59 = vector.extract_strided_slice %50 {offsets = [0, 512], sizes = [64, 128], strides = [1, 1]} : vector<64x640xf32> to vector<64x128xf32>
    %60 = arith.maximumf %57, %58 : vector<64x128xf32>
    %61 = arith.maximumf %60, %59 : vector<64x128xf32>
    %62 = arith.subf %57, %61 : vector<64x128xf32>
    %63 = math.exp %62 : vector<64x128xf32>
    %64 = arith.subf %58, %61 : vector<64x128xf32>
    %65 = math.exp %64 : vector<64x128xf32>
    %66 = arith.subf %59, %61 : vector<64x128xf32>
    %67 = math.exp %66 : vector<64x128xf32>
    %68 = arith.addf %63, %65 : vector<64x128xf32>
    %69 = arith.addf %68, %67 : vector<64x128xf32>
    %70 = arith.mulf %27, %56 : vector<64x256xf32>
    %cst_27 = arith.constant dense<0.000000e+00> : vector<64xf32>
    %71 = vector.multi_reduction <add>, %70, %cst_27 [1] : vector<64x256xf32> to vector<64xf32>
    %72 = vector.shape_cast %71 : vector<64xf32> to vector<64x1xf32>
    %73 = arith.mulf %70, %70 : vector<64x256xf32>
    %cst_28 = arith.constant dense<0.000000e+00> : vector<64xf32>
    %74 = vector.multi_reduction <add>, %73, %cst_28 [1] : vector<64x256xf32> to vector<64xf32>
    %75 = vector.shape_cast %74 : vector<64xf32> to vector<64x1xf32>
    %cst_29 = arith.constant 3.906250e-03 : f32
    %76 = vector.broadcast %cst_29 : f32 to vector<64x1xf32>
    %77 = arith.mulf %72, %76 : vector<64x1xf32>
    %cst_30 = arith.constant 3.906250e-03 : f32
    %78 = vector.broadcast %cst_30 : f32 to vector<64x1xf32>
    %79 = arith.mulf %75, %78 : vector<64x1xf32>
    %80 = arith.mulf %77, %77 : vector<64x1xf32>
    %81 = arith.subf %79, %80 : vector<64x1xf32>
    %82 = vector.broadcast %77 : vector<64x1xf32> to vector<64x256xf32>
    %83 = arith.subf %70, %82 : vector<64x256xf32>
    %cst_31 = arith.constant 9.99999974E-6 : f32
    %84 = vector.broadcast %cst_31 : f32 to vector<64x1xf32>
    %85 = arith.addf %81, %84 : vector<64x1xf32>
    %86 = math.rsqrt %85 : vector<64x1xf32>
    %87 = vector.broadcast %86 : vector<64x1xf32> to vector<64x256xf32>
    %88 = arith.mulf %83, %87 : vector<64x256xf32>
    %89 = arith.mulf %88, %19 : vector<64x256xf32>
    %90 = arith.addf %89, %22 : vector<64x256xf32>
    %91 = arith.truncf %90 : vector<64x256xf32> to vector<64x256xbf16>
    %cst_32 = arith.constant dense<0.000000e+00> : vector<64x128xf32>
    %92 = tpu.matmul %91, %4, %cst_32 {dimension_numbers = #tpu.dot_dimension_numbers<[1], [0], [0], [1], [0, 0, 1, 1], [], []>} : vector<64x256xbf16>, vector<256x128xbf16>, vector<64x128xf32> -> vector<64x128xf32>
    %93 = arith.addf %92, %10 : vector<64x128xf32>
    %94 = math.tanh %93 : vector<64x128xf32>
    %95 = arith.mulf %26, %63 : vector<64x128xf32>
    %96 = arith.mulf %23, %65 : vector<64x128xf32>
    %97 = arith.addf %95, %96 : vector<64x128xf32>
    %98 = arith.mulf %94, %67 : vector<64x128xf32>
    %99 = arith.addf %97, %98 : vector<64x128xf32>
    %100 = arith.divf %99, %69 : vector<64x128xf32>
    %101 = arith.index_cast %c0_i32_18 : i32 to index
    %c0_33 = arith.constant 0 : index
    %c0_34 = arith.constant 0 : index
    %102 = vector.load %arg11[%101, %c0_33, %c0_34] : memref<1x64x128xf32, #tpu.memory_space<vmem>>, vector<1x64x128xf32>
    %103 = vector.shape_cast %102 : vector<1x64x128xf32> to vector<64x128xf32>
    %104 = vector.shape_cast %100 : vector<64x128xf32> to vector<1x64x128xf32>
    tpu.vector_store %arg11[%101, %c0_33, %c0_34], %104 {strides = array<i32>} : memref<1x64x128xf32, #tpu.memory_space<vmem>>, vector<1x64x128xf32>,
    %c1_i32 = arith.constant 1 : i32
    %c0_35 = arith.constant 0 : index
    %c0_36 = arith.constant 0 : index
    %105 = vector.load %arg12[%c0_35, %c0_36] : memref<64x128xf32, #tpu.memory_space<vmem>>, vector<64x128xf32>
    tpu.vector_store %arg12[%c0_35, %c0_36], %100 {strides = array<i32>} : memref<64x128xf32, #tpu.memory_space<vmem>>, vector<64x128xf32>,
    return
  }
  func.func @transform_0(%arg0: i32) -> (i32, i32, i32) {
    %c0_i32 = arith.constant 0 : i32
    %c0_i32_0 = arith.constant 0 : i32
    %c0_i32_1 = arith.constant 0 : i32
    return %arg0, %c0_i32, %c0_i32_0 : i32, i32, i32
  }
  func.func @transform_1(%arg0: i32) -> (i32, i32) {
    %c0_i32 = arith.constant 0 : i32
    %c0_i32_0 = arith.constant 0 : i32
    %c0_i32_1 = arith.constant 0 : i32
    return %c0_i32, %c0_i32_0 : i32, i32
  }
  func.func @transform_2(%arg0: i32) -> (i32, i32) {
    %c0_i32 = arith.constant 0 : i32
    %c0_i32_0 = arith.constant 0 : i32
    %c0_i32_1 = arith.constant 0 : i32
    return %c0_i32, %c0_i32_0 : i32, i32
  }
  func.func @transform_3(%arg0: i32) -> (i32, i32) {
    %c0_i32 = arith.constant 0 : i32
    %c0_i32_0 = arith.constant 0 : i32
    %c0_i32_1 = arith.constant 0 : i32
    return %c0_i32, %c0_i32_0 : i32, i32
  }
  func.func @transform_4(%arg0: i32) -> (i32, i32) {
    %c0_i32 = arith.constant 0 : i32
    %c0_i32_0 = arith.constant 0 : i32
    %c0_i32_1 = arith.constant 0 : i32
    return %c0_i32, %c0_i32_0 : i32, i32
  }
  func.func @transform_5(%arg0: i32) -> (i32, i32) {
    %c0_i32 = arith.constant 0 : i32
    %c0_i32_0 = arith.constant 0 : i32
    %c0_i32_1 = arith.constant 0 : i32
    return %c0_i32, %c0_i32_0 : i32, i32
  }
  func.func @transform_6(%arg0: i32) -> (i32, i32) {
    %c0_i32 = arith.constant 0 : i32
    %c0_i32_0 = arith.constant 0 : i32
    %c0_i32_1 = arith.constant 0 : i32
    return %c0_i32, %c0_i32_0 : i32, i32
  }
  func.func @transform_7(%arg0: i32) -> (i32, i32) {
    %c0_i32 = arith.constant 0 : i32
    %c0_i32_0 = arith.constant 0 : i32
    %c0_i32_1 = arith.constant 0 : i32
    return %c0_i32, %c0_i32_0 : i32, i32
  }
  func.func @transform_8(%arg0: i32) -> (i32, i32) {
    %c0_i32 = arith.constant 0 : i32
    %c0_i32_0 = arith.constant 0 : i32
    %c0_i32_1 = arith.constant 0 : i32
    return %c0_i32, %c0_i32_0 : i32, i32
  }
  func.func @transform_9(%arg0: i32) -> (i32, i32) {
    %c0_i32 = arith.constant 0 : i32
    %c0_i32_0 = arith.constant 0 : i32
    %c0_i32_1 = arith.constant 0 : i32
    return %c0_i32, %c0_i32_0 : i32, i32
  }
  func.func @transform_10(%arg0: i32) -> (i32, i32, i32) {
    %c0_i32 = arith.constant 0 : i32
    %c0_i32_0 = arith.constant 0 : i32
    %c0_i32_1 = arith.constant 0 : i32
    return %arg0, %c0_i32, %c0_i32_0 : i32, i32, i32
  }
}

</mosaic_0001>

<bundles_post_ra>
// kernel: tpu_custom_call.1
= control target key start
LH: loop header
LB: loop body
LE: loop exit
PB: predicated region body
PF: predicated region fallthrough
CT: control target
= control target key end

     0   :  { %15 = vsyncpa [#allocation4], 0  ;;  %s3307_s0 = inlined_call_operand.hbm [shape: f32[1,64,128], index: 0, kind: input, shape index: {}]   ;;  %s3308_s1 = inlined_call_operand.hbm [shape: f32[64,128], index: 1, kind: input, shape index: {}]   ;;  %s3309_s2 = inlined_call_operand.hbm [shape: bf16[256,640], index: 2, kind: input, shape index: {}]   ;;  %s3310_s3 = inlined_call_operand.vmem [shape: f32[1,640], index: 3, kind: input, shape index: {}]   ;;  %s3311_s4 = inlined_call_operand.hbm [shape: bf16[256,128], index: 4, kind: input, shape index: {}]   ;;  %s3312_s5 = inlined_call_operand.vmem [shape: f32[1,128], index: 5, kind: input, shape index: {}]   ;;  %s3313_s6 = inlined_call_operand.vmem [shape: f32[1,256], index: 6, kind: input, shape index: {}]   ;;  %s3314_s7 = inlined_call_operand.vmem [shape: f32[1,256], index: 7, kind: input, shape index: {}]   ;;  %s3315_s8 = inlined_call_operand.vmem [shape: f32[1,256], index: 8, kind: input, shape index: {}]   ;;  %s3316_s9 = inlined_call_operand.vmem [shape: f32[1,256], index: 9, kind: input, shape index: {}]   ;;  %s3317_s10 = inlined_call_operand.hbm [shape: f32[1,64,128], index: 10, kind: output, shape index: {}]  }
   0x1   :  { %16 = vsyncpa [#allocation7], 0 }
   0x2   :  { %17 = vsyncpa [#allocation10], 0 }
   0x3   :  { %18 = vsyncpa [#allocation5], 0  ;;  %s2451_s13 = smov [#allocation6]   ;;  %s2452_s15 = smov [#allocation3]  }
   0x4   :  { %s36_s14 = sshll.u32 %s2451_s13, 4  ;;  %s24_s16 = sshll.u32 %s2452_s15, 4  ;;  %s37_s14 = int_to_ptr.vmem [resolvable:$true] %s36_s14  ;;  %s2517_s16 = int_to_ptr.vmem [resolvable:$true] %s24_s16 }
   0x5   :  { %s2333_s19 = scalar_lea.hbm %s3308_s1, 1024 }
   0x6   :  { %p2334_p0 = scmp.ne.s32.totalorder %s3308_s1, %s2333_s19  ;;  %p2337_p1 = scmp.lt.u32.totalorder %s2333_s19, %s3308_s1 }
   0x8   :  { %p2339_p2 = pnand %p2337_p1, %p2334_p0 }
   0xa   :  { %2342 = shalt.err (!%p2339_p2)
}
   0xb   :  { %s2343_s24 = scalar_lea.vmem %s37_s14, 1024  ;;  %p2348_p4 = scmp.lt.s32.totalorder %s37_s14, %s37_s14 }
   0xc   :  { %p2344_p3 = scmp.ne.s32.totalorder %s37_s14, %s2343_s24  ;;  %p2349_p5 = scmp.lt.s32.totalorder %s2343_s24, %s2343_s24 }
   0xe   :  { %p2350_p6 = por %p2349_p5, %p2348_p4 }
  0x10   :  { %p2351_p7 = pnand %p2350_p6, %p2344_p3 }
  0x12   :  { %2354 = shalt.err (!%p2351_p7)
}
  0x13   :  { %s2453_s25 = smov 128   ;;  %s2454_s26 = smov 8  }
  0x14   :  { %42 = dma.hbm_to_vmem [thread:$0]  %s3308_s1, 1024, %s37_s14, [#allocation7], %s2453_s25, %s2453_s25, %s2454_s26  }
  0x15   :  { %s2355_s11 = scalar_lea.hbm %s3307_s0, 1024 }
  0x16   :  { %p2356_p8 = scmp.ne.s32.totalorder %s3307_s0, %s2355_s11  ;;  %p2359_p9 = scmp.lt.u32.totalorder %s2355_s11, %s3307_s0 }
  0x18   :  { %p2361_p10 = pnand %p2359_p9, %p2356_p8 }
  0x1a   :  { %2364 = shalt.err (!%p2361_p10)
}
  0x1b   :  { %s2365_s18 = scalar_lea.vmem %s2517_s16, 1024  ;;  %p2370_p12 = scmp.lt.s32.totalorder %s2517_s16, %s2517_s16 }
  0x1c   :  { %p2366_p11 = scmp.ne.s32.totalorder %s2517_s16, %s2365_s18  ;;  %p2371_p13 = scmp.lt.s32.totalorder %s2365_s18, %s2365_s18 }
  0x1e   :  { %p2372_p0 = por %p2371_p13, %p2370_p12 }
  0x20   :  { %p2373_p1 = pnand %p2372_p0, %p2366_p11 }
  0x22   :  { %2376 = shalt.err (!%p2373_p1)
}
  0x23   :  { %30 = dma.hbm_to_vmem [thread:$0]  %s3307_s0, 1024, %s2517_s16, [#allocation4], %s2453_s25, %s2453_s25, %s2454_s26  }
  0x24   :  { %s2455_s19 = smov [#allocation8]   ;;  %s2377_s23 = scalar_lea.hbm %s3309_s2, 10240 }
  0x25   :  { %s48_s20 = sshll.u32 %s2455_s19, 4  ;;  %p2378_p2 = scmp.ne.s32.totalorder %s3309_s2, %s2377_s23  ;;  %s49_s20 = int_to_ptr.vmem [resolvable:$true] %s48_s20 }
  0x26   :  { %p2381_p3 = scmp.lt.u32.totalorder %s2377_s23, %s3309_s2 }
  0x28   :  { %p2383_p4 = pnand %p2381_p3, %p2378_p2 }
  0x2a   :  { %2386 = shalt.err (!%p2383_p4)
}
  0x2b   :  { %s2387_s30 = scalar_lea.vmem %s49_s20, 10240  ;;  %p2392_p6 = scmp.lt.s32.totalorder %s49_s20, %s49_s20 }
  0x2c   :  { %p2388_p5 = scmp.ne.s32.totalorder %s49_s20, %s2387_s30  ;;  %p2393_p7 = scmp.lt.s32.totalorder %s2387_s30, %s2387_s30 }
  0x2e   :  { %p2394_p8 = por %p2393_p7, %p2392_p6 }
  0x30   :  { %p2395_p9 = pnand %p2394_p8, %p2388_p5 }
  0x32   :  { %2398 = shalt.err (!%p2395_p9)
}
  0x33   :  { %s2456_s0 = smov 320   ;;  %s2457_s16 = smov 20  }
  0x34   :  { %54 = dma.hbm_to_vmem [thread:$0]  %s3309_s2, 10240, %s49_s20, [#allocation7], %s2456_s0, %s2456_s0, %s2457_s16  }
  0x35   :  { %s2458_s13 = smov [#allocation9]   ;;  %s2399_s1 = scalar_lea.hbm %s3311_s4, 2048 }
  0x36   :  { %s62_s15 = sshll.u32 %s2458_s13, 4  ;;  %p2400_p10 = scmp.ne.s32.totalorder %s3311_s4, %s2399_s1  ;;  %s63_s15 = int_to_ptr.vmem [resolvable:$true] %s62_s15 }
  0x37   :  { %p2403_p11 = scmp.lt.u32.totalorder %s2399_s1, %s3311_s4 }
  0x39   :  { %p2405_p12 = pnand %p2403_p11, %p2400_p10 }
  0x3b   :  { %2408 = shalt.err (!%p2405_p12)
}
  0x3c   :  { %s2409_s23 = scalar_lea.vmem %s63_s15, 2048  ;;  %p2414_p0 = scmp.lt.s32.totalorder %s63_s15, %s63_s15 }
  0x3d   :  { %p2410_p13 = scmp.ne.s32.totalorder %s63_s15, %s2409_s23  ;;  %p2415_p1 = scmp.lt.s32.totalorder %s2409_s23, %s2409_s23 }
  0x3f   :  { %p2416_p2 = por %p2415_p1, %p2414_p0 }
  0x41   :  { %p2417_p3 = pnand %p2416_p2, %p2410_p13 }
  0x43   :  { %2420 = shalt.err (!%p2417_p3)
}
  0x44   :  { %s2459_s2 = smov 64   ;;  %s2460_s20 = smov 4  }
  0x45   :  { %68 = dma.hbm_to_vmem [thread:$0]  %s3311_s4, 2048, %s63_s15, [#allocation10], %s2459_s2, %s2459_s2, %s2460_s20  }
  0x46   :  { %2443 = dma.done.wait [#allocation4], 1024  }
  0x47   :  { %2444 = vsyncadd [#allocation4], 4294966272 }
  0x48   :  { %2445 = dma.done.wait [#allocation7], 11264  }
  0x49   :  { %2446 = vsyncadd [#allocation7], 4294956032 }
  0x4a   :  { %2447 = dma.done.wait [#allocation10], 2048  }
  0x4b   :  { %2448 = vsyncadd [#allocation10], 4294965248  ;;  %v2578_v0 = vld [vmem:[#allocation6] sm:$0xff]  ;;  %v2582_v2 = vld [vmem:[#allocation6 + $0x8] sm:$0xff] }
  0x4c   :  { %v2580_v1 = vld [vmem:[#allocation3] sm:$0xff]  ;;  %v363_v5 = vmul.f32 %v2578_v0, %v2578_v0  ;;  %v2590_v6 = vld [vmem:[#allocation3 + $0x8] sm:$0xff]  ;;  %v365_v7 = vmul.f32 %v2582_v2, %v2582_v2  ;;  %v2598_v11 = vld [vmem:[#allocation6 + $0x10] sm:$0xff] }
  0x4d   :  { %v338_v3 = vadd.f32 %v2580_v1, %v2578_v0  ;;  %v362_v4 = vmul.f32 %v2580_v1, %v2580_v1  ;;  %v364_v8 = vmul.f32 %v2590_v6, %v2590_v6  ;;  %v341_v10 = vadd.f32 %v2590_v6, %v2582_v2  ;;  %v2600_v12 = vld [vmem:[#allocation3 + $0x10] sm:$0xff]  ;;  %v2602_v13 = vld [vmem:[#allocation6 + $0x18] sm:$0xff]  ;;  %v2015_v20 = vld [vmem:[#allocation8 + $0xc] ss:$20 sps:$4 sm:$0xff]  }
  0x4e   :  { %v2604_v15 = vld [vmem:[#allocation3 + $0x18] sm:$0xff]  ;;  %v344_v17 = vadd.f32 %v2600_v12, %v2598_v11  ;;  %v366_v18 = vmul.f32 %v2600_v12, %v2600_v12  ;;  %v367_v19 = vmul.f32 %v2598_v11, %v2598_v11  ;;  %v2017_v21 = vld [vmem:[#allocation8] ss:$20 sps:$4 sm:$0xff]   ;;  %v369_v26 = vmul.f32 %v2602_v13, %v2602_v13  ;;  %1011 = vmatprep.subr.bf16.mxu1 %v2015_v20  ;;  %v2024_v31 = vld [vmem:[#allocation8 + $0x30] ss:$20 sps:$4 sm:$0xff]  }
  0x4f   :  { %339 = vadd.xlane.f32.xlu0 %v338_v3  ;;  %v378_v9 = vadd.f32 %v363_v5, %v362_v4  ;;  %v381_v14 = vadd.f32 %v365_v7, %v364_v8  ;;  %v2013_v16 = vld [vmem:[#allocation8 + $0x4] ss:$20 sps:$4 sm:$0xff]   ;;  %v2018_v22 = vld [vmem:[#allocation8 + $0x8] ss:$20 sps:$4 sm:$0xff]   ;;  %v2019_v23 = vld [vmem:[#allocation8 + $0x2c] ss:$20 sps:$4 sm:$0xff]   ;;  %v347_v24 = vadd.f32 %v2604_v15, %v2602_v13  ;;  %v368_v25 = vmul.f32 %v2604_v15, %v2604_v15 }
  0x50   :  { %938 = vmatprep.subr.bf16.mxu0 %v2013_v16  ;;  %v2021_v27 = vld [vmem:[#allocation8 + $0x34] ss:$20 sps:$4 sm:$0xff]   ;;  %v2618_v28 = vld [vmem:[#allocation6 + $0x20] sm:$0xff]  ;;  %1012 = vmatpush1.bf16.msra.mxu1 %v2018_v22  ;;  %v384_v32 = vadd.f32 %v367_v19, %v366_v18  ;;  %v2027_v36 = vld [vmem:[#allocation8 + $0x5c] ss:$20 sps:$4 sm:$0xff]  }
  0x51   :  { %379 = vadd.xlane.f32.xlu1 %v378_v9  ;;  %v2620_v29 = vld [vmem:[#allocation3 + $0x20] sm:$0xff]  ;;  %939 = vmatpush1.bf16.msra.mxu0 %v2017_v21  ;;  %v2023_v30 = vld [vmem:[#allocation8 + $0x28] ss:$20 sps:$4 sm:$0xff]   ;;  %v387_v37 = vadd.f32 %v369_v26, %v368_v25  ;;  %v2030_v39 = vld [vmem:[#allocation8 + $0x58] ss:$20 sps:$4 sm:$0xff]   ;;  %v371_v42 = vmul.f32 %v2618_v28, %v2618_v28 }
  0x52   :  { %940 = vmatprep.subr.bf16.mxu0 %v2019_v23  ;;  %v2025_v33 = vld [vmem:[#allocation8 + $0x54] ss:$20 sps:$4 sm:$0xff]   ;;  %1013 = vmatprep.subr.bf16.mxu1 %v2021_v27  ;;  %v2029_v38 = vld [vmem:[#allocation8 + $0x50] ss:$20 sps:$4 sm:$0xff]   ;;  %v350_v40 = vadd.f32 %v2620_v29, %v2618_v28  ;;  %v370_v41 = vmul.f32 %v2620_v29, %v2620_v29  ;;  %v2035_v50 = vld [vmem:[#allocation8 + $0x78] ss:$20 sps:$4 sm:$0xff]  }
  0x53   :  { %342 = vadd.xlane.f32.xlu0 %v341_v10  ;;  %v2622_v34 = vld [vmem:[#allocation6 + $0x28] sm:$0xff]  ;;  %v2031_v43 = vld [vmem:[#allocation8 + $0x7c] ss:$20 sps:$4 sm:$0xff]   ;;  %v2033_v44 = vld [vmem:[#allocation8 + $0x84] ss:$20 sps:$4 sm:$0xff]  }
  0x54   :  { %v2624_v35 = vld [vmem:[#allocation3 + $0x28] sm:$0xff]  ;;  %1014 = vmatpush1.bf16.msra.mxu1 %v2024_v31  ;;  %v373_v47 = vmul.f32 %v2622_v34, %v2622_v34  ;;  %v2638_v48 = vld [vmem:[#allocation6 + $0x30] sm:$0xff]  ;;  %v390_v52 = vadd.f32 %v371_v42, %v370_v41  ;;  %v2037_v53 = vld [vmem:[#allocation8 + $0xa4] ss:$20 sps:$4 sm:$0xff]  }
  0x55   :  { %382 = vadd.xlane.f32.xlu1 %v381_v14  ;;  %941 = vmatpush1.bf16.msra.mxu0 %v2023_v30  ;;  %v353_v45 = vadd.f32 %v2624_v35, %v2622_v34  ;;  %v372_v46 = vmul.f32 %v2624_v35, %v2624_v35  ;;  %v2640_v49 = vld [vmem:[#allocation3 + $0x30] sm:$0xff]  ;;  %v2642_v54 = vld [vmem:[#allocation6 + $0x38] sm:$0xff]  ;;  %v2039_v56 = vld [vmem:[#allocation8 + $0xac] ss:$20 sps:$4 sm:$0xff]   ;;  %v375_v62 = vmul.f32 %v2638_v48, %v2638_v48 }
  0x56   :  { %942 = vmatprep.subr.bf16.mxu0 %v2025_v33  ;;  %1015 = vmatprep.subr.bf16.mxu1 %v2027_v36  ;;  %v2036_v51 = vld [vmem:[#allocation8 + $0x80] ss:$20 sps:$4 sm:$0xff]   ;;  %v2644_v55 = vld [vmem:[#allocation3 + $0x38] sm:$0xff]  ;;  %v356_v60 = vadd.f32 %v2640_v49, %v2638_v48  ;;  %v374_v61 = vmul.f32 %v2640_v49, %v2640_v49  ;;  %v377_v7 = vmul.f32 %v2642_v54, %v2642_v54  ;;  %v2048_v9 = vld [vmem:[#allocation8 + $0xd0] ss:$20 sps:$4 sm:$0xff]  }
  0x57   :  { %345 = vadd.xlane.f32.xlu0 %v344_v17  ;;  %v393_v57 = vadd.f32 %v373_v47, %v372_v46  ;;  %v2041_v58 = vld [vmem:[#allocation8 + $0xa0] ss:$20 sps:$4 sm:$0xff]   ;;  %v2042_v59 = vld [vmem:[#allocation8 + $0xa8] ss:$20 sps:$4 sm:$0xff]   ;;  %v359_v4 = vadd.f32 %v2644_v55, %v2642_v54  ;;  %v376_v5 = vmul.f32 %v2644_v55, %v2644_v55  ;;  %v2053_v18 = vld [vmem:[#allocation8 + $0xf0] ss:$20 sps:$4 sm:$0xff]  }
  0x58   :  { %1016 = vmatpush1.bf16.msra.mxu1 %v2030_v39  ;;  %v2043_v63 = vld [vmem:[#allocation8 + $0xcc] ss:$20 sps:$4 sm:$0xff]   ;;  %v2045_v3 = vld [vmem:[#allocation8 + $0xd4] ss:$20 sps:$4 sm:$0xff]   ;;  %v396_v10 = vadd.f32 %v375_v62, %v374_v61  ;;  %v2051_v16 = vld [vmem:[#allocation8 + $0xfc] ss:$20 sps:$4 sm:$0xff]  }
  0x59   :  { %348 = vadd.xlane.f32.xlu1 %v347_v24  ;;  %943 = vmatpush1.bf16.msra.mxu0 %v2029_v38  ;;  %v2047_v8 = vld [vmem:[#allocation8 + $0xc8] ss:$20 sps:$4 sm:$0xff]   ;;  %v399_v17 = vadd.f32 %v377_v7, %v376_v5  ;;  %v2054_v19 = vld [vmem:[#allocation8 + $0xf8] ss:$20 sps:$4 sm:$0xff]   ;;  %v2060_v23 = vld [vmem:[#allocation8 + $0x120] ss:$20 sps:$4 sm:$0xff]  }
  0x5a   :  { %944 = vmatprep.subr.bf16.mxu0 %v2031_v43  ;;  %1017 = vmatprep.subr.bf16.mxu1 %v2033_v44  ;;  %v2049_v14 = vld [vmem:[#allocation8 + $0xf4] ss:$20 sps:$4 sm:$0xff]   ;;  %v2055_v20 = vld [vmem:[#allocation8 + $0x11c] ss:$20 sps:$4 sm:$0xff]   ;;  %v2057_v21 = vld [vmem:[#allocation8 + $0x124] ss:$20 sps:$4 sm:$0xff]  }
  0x5b   :  { %385 = vadd.xlane.f32.xlu0 %v384_v32  ;;  %v2059_v22 = vld [vmem:[#allocation8 + $0x118] ss:$20 sps:$4 sm:$0xff]   ;;  %v2065_v26 = vld [vmem:[#allocation8 + $0x140] ss:$20 sps:$4 sm:$0xff]   ;;  %v2066_v27 = vld [vmem:[#allocation8 + $0x148] ss:$20 sps:$4 sm:$0xff]  }
  0x5c   :  { %1018 = vmatpush1.bf16.msra.mxu1 %v2036_v51  ;;  %v2061_v24 = vld [vmem:[#allocation8 + $0x144] ss:$20 sps:$4 sm:$0xff]   ;;  %v2063_v25 = vld [vmem:[#allocation8 + $0x14c] ss:$20 sps:$4 sm:$0xff]   ;;  %v2069_v31 = vld [vmem:[#allocation8 + $0x174] ss:$20 sps:$4 sm:$0xff]  }
  0x5d   :  { %388 = vadd.xlane.f32.xlu1 %v387_v37  ;;  %945 = vmatpush1.bf16.msra.mxu0 %v2035_v50  ;;  %v2067_v30 = vld [vmem:[#allocation8 + $0x16c] ss:$20 sps:$4 sm:$0xff]   ;;  %v2071_v32 = vld [vmem:[#allocation8 + $0x168] ss:$20 sps:$4 sm:$0xff]   ;;  %v2072_v33 = vld [vmem:[#allocation8 + $0x170] ss:$20 sps:$4 sm:$0xff]  }
  0x5e   :  { %946 = vmatprep.subr.bf16.mxu0 %v2037_v53  ;;  %1019 = vmatprep.subr.bf16.mxu1 %v2039_v56  ;;  %v2073_v36 = vld [vmem:[#allocation8 + $0x194] ss:$20 sps:$4 sm:$0xff]   ;;  %v2075_v37 = vld [vmem:[#allocation8 + $0x19c] ss:$20 sps:$4 sm:$0xff]   ;;  %v2078_v39 = vld [vmem:[#allocation8 + $0x198] ss:$20 sps:$4 sm:$0xff]  }
  0x5f   :  { %351 = vadd.xlane.f32.xlu0 %v350_v40  ;;  %v2077_v38 = vld [vmem:[#allocation8 + $0x190] ss:$20 sps:$4 sm:$0xff]   ;;  %v2083_v42 = vld [vmem:[#allocation8 + $0x1b8] ss:$20 sps:$4 sm:$0xff]   ;;  %v2084_v43 = vld [vmem:[#allocation8 + $0x1c0] ss:$20 sps:$4 sm:$0xff]  }
  0x60   :  { %1020 = vmatpush1.bf16.msra.mxu1 %v2042_v59  ;;  %v2079_v40 = vld [vmem:[#allocation8 + $0x1bc] ss:$20 sps:$4 sm:$0xff]   ;;  %v2081_v41 = vld [vmem:[#allocation8 + $0x1c4] ss:$20 sps:$4 sm:$0xff]   ;;  %v2089_v46 = vld [vmem:[#allocation8 + $0x1e0] ss:$20 sps:$4 sm:$0xff]  }
  0x61   :  { %354 = vadd.xlane.f32.xlu1 %v353_v45  ;;  %947 = vmatpush1.bf16.msra.mxu0 %v2041_v58  ;;  %v2085_v44 = vld [vmem:[#allocation8 + $0x1e4] ss:$20 sps:$4 sm:$0xff]   ;;  %v2087_v45 = vld [vmem:[#allocation8 + $0x1ec] ss:$20 sps:$4 sm:$0xff]   ;;  %v2090_v47 = vld [vmem:[#allocation8 + $0x1e8] ss:$20 sps:$4 sm:$0xff]  }
  0x62   :  { %948 = vmatprep.subr.bf16.mxu0 %v2043_v63  ;;  %1021 = vmatprep.subr.bf16.mxu1 %v2045_v3  ;;  %v2091_v50 = vld [vmem:[#allocation8 + $0x20c] ss:$20 sps:$4 sm:$0xff]   ;;  %v2093_v51 = vld [vmem:[#allocation8 + $0x214] ss:$20 sps:$4 sm:$0xff]   ;;  %v2096_v53 = vld [vmem:[#allocation8 + $0x210] ss:$20 sps:$4 sm:$0xff]  }
  0x63   :  { %391 = vadd.xlane.f32.xlu0 %v390_v52  ;;  %v2095_v52 = vld [vmem:[#allocation8 + $0x208] ss:$20 sps:$4 sm:$0xff]   ;;  %v2101_v58 = vld [vmem:[#allocation8 + $0x230] ss:$20 sps:$4 sm:$0xff]   ;;  %v2102_v59 = vld [vmem:[#allocation8 + $0x238] ss:$20 sps:$4 sm:$0xff]  }
  0x64   :  { %1022 = vmatpush1.bf16.msra.mxu1 %v2048_v9  ;;  %v2097_v56 = vld [vmem:[#allocation8 + $0x234] ss:$20 sps:$4 sm:$0xff]   ;;  %v2105_v61 = vld [vmem:[#allocation8 + $0x264] ss:$20 sps:$4 sm:$0xff]  }
  0x65   :  { %394 = vadd.xlane.f32.xlu1 %v393_v57  ;;  %949 = vmatpush1.bf16.msra.mxu0 %v2047_v8  ;;  %v2099_v57 = vld [vmem:[#allocation8 + $0x23c] ss:$20 sps:$4 sm:$0xff]   ;;  %v2107_v62 = vld [vmem:[#allocation8 + $0x258] ss:$20 sps:$4 sm:$0xff]   ;;  %v2108_v63 = vld [vmem:[#allocation8 + $0x260] ss:$20 sps:$4 sm:$0xff]  }
  0x66   :  { %950 = vmatprep.subr.bf16.mxu0 %v2049_v14  ;;  %1023 = vmatprep.subr.bf16.mxu1 %v2051_v16  ;;  %v2109_v3 = vld [vmem:[#allocation8 + $0x150] ss:$20 sps:$4 sm:$0xff]  }
  0x67   :  { %357 = vadd.xlane.f32.xlu0 %v356_v60  ;;  %v2103_v60 = vld [vmem:[#allocation8 + $0x25c] ss:$20 sps:$4 sm:$0xff]  }
  0x68   :  { %1024 = vmatpush1.bf16.msra.mxu1 %v2054_v19 }
  0x69   :  { %360 = vadd.xlane.f32.xlu1 %v359_v4  ;;  %951 = vmatpush1.bf16.msra.mxu0 %v2053_v18 }
  0x6a   :  { %952 = vmatprep.subr.bf16.mxu0 %v2055_v20  ;;  %1025 = vmatprep.subr.bf16.mxu1 %v2057_v21 }
  0x6b   :  { %397 = vadd.xlane.f32.xlu0 %v396_v10 }
  0x6c   :  { %1026 = vmatpush1.bf16.msra.mxu1 %v2060_v23 }
  0x6d   :  { %400 = vadd.xlane.f32.xlu1 %v399_v17  ;;  %953 = vmatpush1.bf16.msra.mxu0 %v2059_v22 }
  0x6e   :  { %954 = vmatprep.subr.bf16.mxu0 %v2061_v24  ;;  %1027 = vmatprep.subr.bf16.mxu1 %v2063_v25  ;;  %v242_v25 = vlaneseq }
  0x70   :  { %1028 = vmatpush1.bf16.msra.mxu1 %v2066_v27 }
  0x71   :  { %955 = vmatpush1.bf16.msra.mxu0 %v2065_v26  ;;  %1029 = vmatprep.subr.bf16.mxu1 %v2069_v31 }
  0x72   :  { %956 = vmatprep.subr.bf16.mxu0 %v2067_v30 }
  0x74   :  { %1030 = vmatpush1.bf16.msra.mxu1 %v2072_v33 }
  0x75   :  { %957 = vmatpush1.bf16.msra.mxu0 %v2071_v32  ;;  %1031 = vmatprep.subr.bf16.mxu1 %v2075_v37 }
  0x76   :  { %958 = vmatprep.subr.bf16.mxu0 %v2073_v36  ;;  %v2664_v36 = vshrl.u32 %v242_v25, 7 }
  0x78   :  { %1032 = vmatpush1.bf16.msra.mxu1 %v2078_v39 }
  0x79   :  { %959 = vmatpush1.bf16.msra.mxu0 %v2077_v38  ;;  %1033 = vmatprep.subr.bf16.mxu1 %v2081_v41 }
  0x7a   :  { %960 = vmatprep.subr.bf16.mxu0 %v2079_v40 }
  0x7c   :  { %1034 = vmatpush1.bf16.msra.mxu1 %v2084_v43 }
  0x7d   :  { %961 = vmatpush1.bf16.msra.mxu0 %v2083_v42  ;;  %1035 = vmatprep.subr.bf16.mxu1 %v2087_v45  ;;  %v2671_v45 = vsub.s32 1, %v2664_v36 }
  0x7e   :  { %962 = vmatprep.subr.bf16.mxu0 %v2085_v44 }
  0x80   :  { %1036 = vmatpush1.bf16.msra.mxu1 %v2090_v47 }
  0x81   :  { %963 = vmatpush1.bf16.msra.mxu0 %v2089_v46  ;;  %1037 = vmatprep.subr.bf16.mxu1 %v2093_v51  ;;  %v2674_v46 = vsub.s32 0, %v2664_v36  ;;  %v274_v51 = vld [vmem:[%s3313_s6] sm:$0x3] }
  0x82   :  { %964 = vmatprep.subr.bf16.mxu0 %v2091_v50 }
  0x84   :  { %1038 = vmatpush1.bf16.msra.mxu1 %v2096_v53 }
  0x85   :  { %965 = vmatpush1.bf16.msra.mxu0 %v2095_v52  ;;  %1039 = vmatprep.subr.bf16.mxu1 %v2099_v57 }
  0x86   :  { %966 = vmatprep.subr.bf16.mxu0 %v2097_v56 }
  0x88   :  { %1040 = vmatpush1.bf16.msra.mxu1 %v2102_v59 }
  0x89   :  { %967 = vmatpush1.bf16.msra.mxu0 %v2101_v58  ;;  %1041 = vmatprep.subr.bf16.mxu1 %v2105_v61 }
  0x8a   :  { %968 = vmatprep.subr.bf16.mxu0 %v2103_v60  ;;  %v286_v60 = vld [vmem:[%s3314_s7] sm:$0x3] }
  0x8c   :  { %1042 = vmatpush1.bf16.msra.mxu1 %v2108_v63 }
  0x8d   :  { %969 = vmatpush1.bf16.msra.mxu0 %v2107_v62  ;;  %v2689_v62 = vrot.slane %v274_v51, %v2671_v45 }
  0x8e   :  { %1922 = vmatprep.subr.bf16.mxu0 %v2109_v3 }
  0xdc   :  { %v340_v4 = vpop.xlane.xlu0 %339 }
  0xdd   :  { %v402_v5 = vmul.f32 0.00390625, %v340_v4 }
  0xde   :  { %v380_v7 = vpop.xlane.xlu1 %379 }
  0xdf   :  { %v410_v8 = vmul.f32 0.00390625, %v380_v7  ;;  %v418_v9 = vmul.f32 %v402_v5, %v402_v5  ;;  %v434_v52 = vsub.f32 %v2580_v1, %v402_v5  ;;  %v435_v53 = vsub.f32 %v2578_v0, %v402_v5 }
  0xe0   :  { %v343_v10 = vpop.xlane.xlu0 %342  ;;  %v2692_v1 = vrot.slane %v274_v51, %v2674_v46 }
  0xe1   :  { %v426_v14 = vsub.f32 %v410_v8, %v418_v9  ;;  %v403_v16 = vmul.f32 0.00390625, %v343_v10 }
  0xe2   :  { %v383_v17 = vpop.xlane.xlu1 %382 }
  0xe3   :  { %v450_v18 = vadd.f32 1e-05, %v426_v14  ;;  %v411_v19 = vmul.f32 0.00390625, %v383_v17  ;;  %v419_v20 = vmul.f32 %v403_v16, %v403_v16  ;;  %v437_v3 = vsub.f32 %v2582_v2, %v403_v16 }
  0xe4   :  { %v346_v21 = vpop.xlane.xlu0 %345  ;;  %v436_v9 = vsub.f32 %v2590_v6, %v403_v16  ;;  %v2699_v14 = vrot.slane %v286_v60, %v2671_v45 }
  0xe5   :  { %2141 = vrsqrt.f32 %v450_v18  ;;  %v2658_v22 = vmul.f32 0.00390625, %v346_v21  ;;  %v427_v23 = vsub.f32 %v411_v19, %v419_v20 }
  0xe6   :  { %v349_v24 = vpop.xlane.xlu1 %348 }
  0xe7   :  { %v2660_v26 = vmul.f32 0.00390625, %v349_v24  ;;  %v420_v27 = vmul.f32 %v2658_v22, %v2658_v22  ;;  %v451_v30 = vadd.f32 1e-05, %v427_v23  ;;  %v2705_v23 = vrot.slane %v286_v60, %v2674_v46 }
  0xe8   :  { %v386_v31 = vpop.xlane.xlu0 %385  ;;  %v438_v6 = vsub.f32 %v2600_v12, %v2658_v22  ;;  %v439_v16 = vsub.f32 %v2598_v11, %v2658_v22 }
  0xe9   :  { %v412_v32 = vmul.f32 0.00390625, %v386_v31  ;;  %2143 = vrsqrt.f32 %v451_v30  ;;  %v421_v38 = vmul.f32 %v2660_v26, %v2660_v26  ;;  %v441_v12 = vsub.f32 %v2602_v13, %v2660_v26  ;;  %v2110_v13 = vld [vmem:[#allocation8 + $0x10] ss:$20 sps:$4 sm:$0xff]  }
  0xea   :  { %v389_v33 = vpop.xlane.xlu1 %388 }
  0xeb   :  { %v428_v37 = vsub.f32 %v412_v32, %v420_v27  ;;  %v413_v39 = vmul.f32 0.00390625, %v389_v33 }
  0xec   :  { %v352_v40 = vpop.xlane.xlu0 %351 }
  0xed   :  { %v452_v41 = vadd.f32 1e-05, %v428_v37  ;;  %v429_v42 = vsub.f32 %v413_v39, %v421_v38  ;;  %v2668_v43 = vmul.f32 0.00390625, %v352_v40  ;;  %v440_v39 = vsub.f32 %v2604_v15, %v2660_v26 }
  0xee   :  { %v355_v44 = vpop.xlane.xlu1 %354 }
  0xef   :  { %v2142_v47 = vpop.eup %2141  ;;  %2145 = vrsqrt.f32 %v452_v41  ;;  %v453_v50 = vadd.f32 1e-05, %v429_v42  ;;  %v2681_v56 = vmul.f32 0.00390625, %v355_v44  ;;  %v422_v57 = vmul.f32 %v2668_v43, %v2668_v43 }
  0xf0   :  { %v392_v58 = vpop.xlane.xlu0 %391  ;;  %v467_v63 = vmul.f32 %v2142_v47, %v435_v53  ;;  %v466_v0 = vmul.f32 %v2142_v47, %v434_v52 }
  0xf1   :  { %2147 = vrsqrt.f32 %v453_v50  ;;  %v414_v59 = vmul.f32 0.00390625, %v392_v58  ;;  %v423_v5 = vmul.f32 %v2681_v56, %v2681_v56 }
  0xf2   :  { %v395_v61 = vpop.xlane.xlu1 %394  ;;  %v483_v2 = vmul.f32 %v467_v63, %v2689_v62  ;;  %v482_v25 = vmul.f32 %v466_v0, %v2692_v1  ;;  %v2111_v63 = vld [vmem:[#allocation8 + $0x178] ss:$20 sps:$4 sm:$0xff]  }
  0xf3   :  { %v430_v4 = vsub.f32 %v414_v59, %v422_v57  ;;  %v415_v7 = vmul.f32 0.00390625, %v395_v61  ;;  %v2144_v8 = vpop.eup %2143 }
  0xf4   :  { %v358_v10 = vpop.xlane.xlu0 %357  ;;  %v469_v20 = vmul.f32 %v2144_v8, %v437_v3  ;;  %v468_v24 = vmul.f32 %v2144_v8, %v436_v9  ;;  %v499_v41 = vadd.f32 %v483_v2, %v2699_v14  ;;  %v498_v44 = vadd.f32 %v482_v25, %v2705_v23 }
  0xf5   :  { %v454_v17 = vadd.f32 1e-05, %v430_v4  ;;  %v431_v18 = vsub.f32 %v415_v7, %v423_v5  ;;  %v2701_v19 = vmul.f32 0.00390625, %v358_v10  ;;  %v442_v7 = vsub.f32 %v2620_v29, %v2668_v43  ;;  %v2112_v10 = vld [vmem:[#allocation8 + $0x38] ss:$20 sps:$4 sm:$0xff]  }
  0xf6   :  { %v361_v21 = vpop.xlane.xlu1 %360  ;;  %v485_v33 = vmul.f32 %v469_v20, %v2689_v62  ;;  %v484_v37 = vmul.f32 %v468_v24, %v2692_v1  ;;  %v443_v9 = vsub.f32 %v2618_v28, %v2668_v43  ;;  %v444_v29 = vsub.f32 %v2624_v35, %v2681_v56  ;;  %v2113_v24 = vld [vmem:[#allocation8 + $0x1a0] ss:$20 sps:$4 sm:$0xff]  }
  0xf7   :  { %2149 = vrsqrt.f32 %v454_v17  ;;  %v455_v27 = vadd.f32 1e-05, %v431_v18  ;;  %v2712_v30 = vmul.f32 0.00390625, %v361_v21  ;;  %v424_v31 = vmul.f32 %v2701_v19, %v2701_v19 }
  0xf8   :  { %v398_v32 = vpop.xlane.xlu0 %397  ;;  %v501_v42 = vadd.f32 %v485_v33, %v2699_v14  ;;  %v500_v15 = vadd.f32 %v484_v37, %v2705_v23  ;;  %v445_v28 = vsub.f32 %v2622_v34, %v2681_v56  ;;  %v2115_v37 = vld [vmem:[#allocation8 + $0x1c8] ss:$20 sps:$4 sm:$0xff]  }
  0xf9   :  { %v2146_v38 = vpop.eup %2145  ;;  %2151 = vrsqrt.f32 %v455_v27  ;;  %v416_v11 = vmul.f32 0.00390625, %v398_v32  ;;  %v425_v22 = vmul.f32 %v2712_v30, %v2712_v30 }
  0xfa   :  { %v401_v40 = vpop.xlane.xlu1 %400  ;;  %v471_v52 = vmul.f32 %v2146_v38, %v439_v16  ;;  %v2728_v53 = vpack.c.bf16 %v501_v42, %v499_v41  ;;  %v470_v57 = vmul.f32 %v2146_v38, %v438_v6  ;;  %v2730_v61 = vpack.c.bf16 %v500_v15, %v498_v44 }
  0xfb   :  { %v2148_v47 = vpop.eup %2147  ;;  %v432_v50 = vsub.f32 %v416_v11, %v424_v31  ;;  %v417_v51 = vmul.f32 0.00390625, %v401_v40  ;;  %v2114_v31 = vld [vmem:[#allocation8 + $0x60] ss:$20 sps:$4 sm:$0xff]   ;;  %v2116_v11 = vld [vmem:[#allocation8 + $0x88] ss:$20 sps:$4 sm:$0xff]   ;;  %v448_v44 = vsub.f32 %v2644_v55, %v2712_v30 }
  0xfc   :  { %v473_v26 = vmul.f32 %v2148_v47, %v441_v12  ;;  %v472_v58 = vmul.f32 %v2148_v47, %v440_v39  ;;  %v487_v0 = vmul.f32 %v471_v52, %v2689_v62  ;;  %970 = vmatprep.mubr.bf16.mxu0 %v2728_v53  ;;  %1043 = vmatprep.mubr.bf16.mxu1 %v2728_v53  ;;  %v2117_v47 = vld [vmem:[#allocation8 + $0x1f0] ss:$20 sps:$4 sm:$0xff]   ;;  %v2119_v55 = vld [vmem:[#allocation8 + $0x218] ss:$20 sps:$4 sm:$0xff]  }
  0xfd   :  { %v456_v59 = vadd.f32 1e-05, %v432_v50  ;;  %v433_v60 = vsub.f32 %v417_v51, %v425_v22  ;;  %v486_v4 = vmul.f32 %v470_v57, %v2692_v1  ;;  %971 = vmatmul.mubr.bf16.vlgmr.msra.gmra.mrb[0].mxu0 %v2730_v61  ;;  %1044 = vmatmul.mubr.bf16.vlgmr.msra.gmra.mrb[0].mxu1 %v2730_v61  ;;  %v446_v39 = vsub.f32 %v2640_v49, %v2701_v19 }
  0xfe   :  { %v489_v3 = vmul.f32 %v473_v26, %v2689_v62  ;;  %v488_v5 = vmul.f32 %v472_v58, %v2692_v1  ;;  %1923 = vmatpush3.bf16.msra.mxu0 %v2110_v13  ;;  %v503_v17 = vadd.f32 %v487_v0, %v2699_v14  ;;  %v447_v12 = vsub.f32 %v2638_v48, %v2701_v19  ;;  %v2118_v13 = vld [vmem:[#allocation8 + $0xb0] ss:$20 sps:$4 sm:$0xff]  }
  0xff   :  { %2153 = vrsqrt.f32 %v456_v59  ;;  %v457_v8 = vadd.f32 1e-05, %v433_v60  ;;  %1924 = vmatprep.subr.bf16.mxu0 %v2111_v63  ;;  %v502_v2 = vadd.f32 %v486_v4, %v2705_v23  ;;  %v449_v50 = vsub.f32 %v2642_v54, %v2712_v30  ;;  %v2120_v30 = vld [vmem:[#allocation8 + $0xd8] ss:$20 sps:$4 sm:$0xff]  }
 0x100   :  { %v505_v18 = vadd.f32 %v489_v3, %v2699_v14  ;;  %v504_v20 = vadd.f32 %v488_v5, %v2705_v23  ;;  %v2121_v5 = vld [vmem:[#allocation8 + $0x240] ss:$20 sps:$4 sm:$0xff]  }
 0x101   :  { %v2150_v21 = vpop.eup %2149  ;;  %2155 = vrsqrt.f32 %v457_v8 }
 0x102   :  { %v2752_v43 = vpack.c.bf16 %v505_v18, %v503_v17  ;;  %v475_v25 = vmul.f32 %v2150_v21, %v443_v9  ;;  %v474_v6 = vmul.f32 %v2150_v21, %v442_v7  ;;  %v2754_v27 = vpack.c.bf16 %v504_v20, %v502_v2  ;;  %1925 = vmatpush3.bf16.msra.mxu0 %v2112_v10 }
 0x103   :  { %v2152_v16 = vpop.eup %2151  ;;  %1926 = vmatprep.subr.bf16.mxu0 %v2113_v24  ;;  %v252_v9 = vsub.s32 2, %v2664_v36  ;;  %v256_v10 = vsub.s32 3, %v2664_v36 }
 0x104   :  { %980 = vmatprep.mubr.bf16.mxu0 %v2752_v43  ;;  %v477_v35 = vmul.f32 %v2152_v16, %v445_v28  ;;  %v491_v32 = vmul.f32 %v475_v25, %v2689_v62  ;;  %v476_v33 = vmul.f32 %v2152_v16, %v444_v29  ;;  %1053 = vmatprep.mubr.bf16.mxu1 %v2752_v43 }
 0x105   :  { %v490_v34 = vmul.f32 %v474_v6, %v2692_v1  ;;  %981 = vmatmul.mubr.bf16.gmra.mrb[4].mxu0 %v2754_v27  ;;  %1054 = vmatmul.mubr.bf16.gmra.mrb[4].mxu1 %v2754_v27 }
 0x106   :  { %v493_v56 = vmul.f32 %v477_v35, %v2689_v62  ;;  %v492_v38 = vmul.f32 %v476_v33, %v2692_v1  ;;  %1927 = vmatpush3.bf16.msra.mxu0 %v2114_v31  ;;  %v507_v22 = vadd.f32 %v491_v32, %v2699_v14 }
 0x107   :  { %1928 = vmatprep.subr.bf16.mxu0 %v2115_v37  ;;  %v506_v49 = vadd.f32 %v490_v34, %v2705_v23 }
 0x108   :  { %v509_v40 = vadd.f32 %v493_v56, %v2699_v14  ;;  %v508_v41 = vadd.f32 %v492_v38, %v2705_v23 }
 0x109   :  { %v2154_v42 = vpop.eup %2153 }
 0x10a   :  { %v519_v48 = vpack.c.bf16 %v509_v40, %v507_v22  ;;  %v479_v19 = vmul.f32 %v2154_v42, %v447_v12  ;;  %v478_v51 = vmul.f32 %v2154_v42, %v446_v39  ;;  %v518_v52 = vpack.c.bf16 %v508_v41, %v506_v49  ;;  %1929 = vmatpush3.bf16.msra.mxu0 %v2116_v11 }
 0x10b   :  { %v2156_v15 = vpop.eup %2155  ;;  %1930 = vmatprep.subr.bf16.mxu0 %v2117_v47 }
 0x10c   :  { %990 = vmatprep.mubr.bf16.mxu0 %v519_v48  ;;  %v481_v26 = vmul.f32 %v2156_v15, %v449_v50  ;;  %v495_v57 = vmul.f32 %v479_v19, %v2689_v62  ;;  %v480_v58 = vmul.f32 %v2156_v15, %v448_v44  ;;  %1063 = vmatprep.mubr.bf16.mxu1 %v519_v48 }
 0x10d   :  { %v494_v59 = vmul.f32 %v478_v51, %v2692_v1  ;;  %991 = vmatmul.mubr.bf16.gmra.mrb[8].mxu0 %v518_v52  ;;  %1064 = vmatmul.mubr.bf16.gmra.mrb[8].mxu1 %v518_v52 }
 0x10e   :  { %v497_v60 = vmul.f32 %v481_v26, %v2689_v62  ;;  %v496_v54 = vmul.f32 %v480_v58, %v2692_v1  ;;  %1931 = vmatpush3.bf16.msra.mxu0 %v2118_v13  ;;  %v511_v63 = vadd.f32 %v495_v57, %v2699_v14  ;;  %v2122_v62 = vld [vmem:[#allocation8 + $0x100] ss:$20 sps:$4 sm:$0xff]   ;;  %v2123_v1 = vld [vmem:[#allocation8 + $0x268] ss:$20 sps:$4 sm:$0xff]  }
 0x10f   :  { %1932 = vmatprep.subr.bf16.mxu0 %v2119_v55  ;;  %v510_v4 = vadd.f32 %v494_v59, %v2705_v23 }
 0x110   :  { %v513_v0 = vadd.f32 %v497_v60, %v2699_v14  ;;  %v512_v3 = vadd.f32 %v496_v54, %v2705_v23  ;;  %v2124_v14 = vld [vmem:[#allocation8 + $0x128] ss:$20 sps:$4 sm:$0xff]   ;;  %v2125_v23 = vld [vmem:[#allocation9 + $0x40] sm:$0xff]  }
 0x111   :  { %1962 = vmatprep.subr.bf16.mxu1 %v2125_v23 }
 0x112   :  { %v521_v7 = vpack.c.bf16 %v513_v0, %v511_v63  ;;  %v520_v8 = vpack.c.bf16 %v512_v3, %v510_v4  ;;  %1933 = vmatpush3.bf16.msra.mxu0 %v2120_v30 }
 0x113   :  { %1934 = vmatprep.subr.bf16.mxu0 %v2121_v5 }
 0x114   :  { %1000 = vmatprep.mubr.bf16.mxu0 %v521_v7  ;;  %1073 = vmatprep.mubr.bf16.mxu1 %v521_v7 }
 0x115   :  { %1001 = vmatmul.mubr.bf16.gmra.mrb[12].mxu0 %v520_v8  ;;  %1074 = vmatmul.mubr.bf16.gmra.mrb[12].mxu1 %v520_v8 }
 0x116   :  { %1935 = vmatpush3.bf16.msra.mxu0 %v2122_v62  ;;  %1116 = vmatprep.mubr.bf16.mxu0 %v2728_v53  ;;  %v2792_v53 = vld [vmem:[%s3310_s3] sm:$0x1f] }
 0x117   :  { %1936 = vmatprep.subr.bf16.mxu0 %v2123_v1  ;;  %v2800_v17 = vrot.slane %v2792_v53, %v252_v9  ;;  %v2804_v18 = vrot.slane %v2792_v53, %v2671_v45  ;;  %v2807_v20 = vrot.slane %v2792_v53, %v256_v10 }
 0x11a   :  { %1937 = vmatpush3.bf16.msra.mxu0 %v2124_v14 }
 0x11d   :  { %1117 = vmatmul.mubr.bf16.vlgmr.msra.gmra.mrb[16].mxu0 %v2730_v61  ;;  %v2797_v61 = vrot.slane %v2792_v53, %v2674_v46 }
 0x11e   :  { %1124 = vmatprep.mubr.bf16.mxu0 %v2752_v43 }
 0x125   :  { %1125 = vmatmul.mubr.bf16.gmra.mrb[20].mxu0 %v2754_v27 }
 0x126   :  { %1132 = vmatprep.mubr.bf16.mxu0 %v519_v48 }
 0x12d   :  { %1133 = vmatmul.mubr.bf16.gmra.mrb[24].mxu0 %v518_v52 }
 0x12e   :  { %1140 = vmatprep.mubr.bf16.mxu0 %v521_v7 }
 0x135   :  { %1141 = vmatmul.mubr.bf16.gmra.mrb[28].mxu0 %v520_v8 }
 0x1d0   :  { %v972_v21 = vpop.f32.mrb[0].mxu0  ;;  %v1045_v29 = vpop.f32.mrb[0].mxu1 }
 0x1d1   :  { %v973_v2 = vadd.f32 %v972_v21, %v2797_v61  ;;  %v2811_v24 = vadd.f32 %v1045_v29, %v2800_v17  ;;  %v974_v28 = vpop.f32.mrb[1].mxu0  ;;  %v1047_v43 = vpop.f32.mrb[1].mxu1 }
 0x1d2   :  { %v975_v25 = vadd.f32 %v974_v28, %v2804_v18  ;;  %v2815_v6 = vadd.f32 %v1047_v43, %v2807_v20  ;;  %v976_v16 = vpop.f32.mrb[2].mxu0  ;;  %v1049_v27 = vpop.f32.mrb[2].mxu1 }
 0x1d3   :  { %v1890_v31 = vmul.f32 -1.442695, %v973_v2  ;;  %v977_v35 = vadd.f32 %v976_v16, %v2797_v61  ;;  %v2819_v32 = vadd.f32 %v1049_v27, %v2800_v17  ;;  %v978_v33 = vpop.f32.mrb[3].mxu0  ;;  %v1051_v37 = vpop.f32.mrb[3].mxu1 }
 0x1d4   :  { %v1891_v34 = vmul.f32 -1.442695, %v975_v25  ;;  %v1245_v56 = vmax.f32 %v2811_v24, %v2815_v6  ;;  %v979_v38 = vadd.f32 %v978_v33, %v2804_v18  ;;  %v2825_v39 = vadd.f32 %v1051_v37, %v2807_v20 }
 0x1d5   :  { %2157 = vpow2.f32 %v1890_v31  ;;  %v1892_v12 = vmul.f32 -1.442695, %v977_v35 }
 0x1d6   :  { %2159 = vpow2.f32 %v1891_v34  ;;  %v1893_v11 = vmul.f32 -1.442695, %v979_v38  ;;  %v1246_v22 = vmax.f32 %v2819_v32, %v2825_v39 }
 0x1d7   :  { %2161 = vpow2.f32 %v1892_v12 }
 0x1d8   :  { %2163 = vpow2.f32 %v1893_v11  ;;  %v982_v40 = vpop.f32.mrb[4].mxu0  ;;  %v1055_v41 = vpop.f32.mrb[4].mxu1 }
 0x1d9   :  { %v983_v42 = vadd.f32 %v982_v40, %v2797_v61  ;;  %v2831_v44 = vadd.f32 %v1055_v41, %v2800_v17  ;;  %v984_v49 = vpop.f32.mrb[5].mxu0  ;;  %v1057_v47 = vpop.f32.mrb[5].mxu1 }
 0x1da   :  { %v985_v50 = vadd.f32 %v984_v49, %v2804_v18  ;;  %v2835_v48 = vadd.f32 %v1057_v47, %v2807_v20  ;;  %v986_v19 = vpop.f32.mrb[6].mxu0  ;;  %v1059_v51 = vpop.f32.mrb[6].mxu1 }
 0x1db   :  { %v1894_v15 = vmul.f32 -1.442695, %v983_v42  ;;  %v987_v52 = vadd.f32 %v986_v19, %v2797_v61  ;;  %v2839_v13 = vadd.f32 %v1059_v51, %v2800_v17  ;;  %v988_v26 = vpop.f32.mrb[7].mxu0  ;;  %v1061_v57 = vpop.f32.mrb[7].mxu1  ;;  %v260_v51 = vsub.s32 4, %v2664_v36 }
 0x1dc   :  { %v1895_v58 = vmul.f32 -1.442695, %v985_v50  ;;  %v1247_v55 = vmax.f32 %v2831_v44, %v2835_v48  ;;  %v989_v59 = vadd.f32 %v988_v26, %v2804_v18  ;;  %v2845_v60 = vadd.f32 %v1061_v57, %v2807_v20 }
 0x1dd   :  { %2165 = vpow2.f32 %v1894_v15  ;;  %v1896_v54 = vmul.f32 -1.442695, %v987_v52 }
 0x1de   :  { %2167 = vpow2.f32 %v1895_v58  ;;  %v1897_v30 = vmul.f32 -1.442695, %v989_v59  ;;  %v1248_v63 = vmax.f32 %v2839_v13, %v2845_v60 }
 0x1df   :  { %v2158_v0 = vpop.eup %2157  ;;  %2169 = vpow2.f32 %v1896_v54 }
 0x1e0   :  { %v2160_v3 = vpop.eup %2159  ;;  %v1197_v4 = vadd.f32 1.0, %v2158_v0  ;;  %2171 = vpow2.f32 %v1897_v30  ;;  %v992_v5 = vpop.f32.mrb[8].mxu0 }
 0x1e1   :  { %v1065_v7 = vpop.f32.mrb[8].mxu1  ;;  %v2162_v8 = vpop.eup %2161  ;;  %v1198_v62 = vadd.f32 1.0, %v2160_v3  ;;  %v993_v1 = vadd.f32 %v992_v5, %v2797_v61 }
 0x1e2   :  { %v2851_v14 = vadd.f32 %v1065_v7, %v2800_v17  ;;  %v994_v23 = vpop.f32.mrb[9].mxu0  ;;  %v1067_v9 = vpop.f32.mrb[9].mxu1  ;;  %2173 = vrcp.f32 %v1197_v4  ;;  %v1199_v21 = vadd.f32 1.0, %v2162_v8 }
 0x1e3   :  { %v2164_v10 = vpop.eup %2163  ;;  %v995_v29 = vadd.f32 %v994_v23, %v2804_v18  ;;  %v2855_v2 = vadd.f32 %v1067_v9, %v2807_v20  ;;  %v996_v28 = vpop.f32.mrb[10].mxu0  ;;  %2175 = vrcp.f32 %v1198_v62  ;;  %v1898_v16 = vmul.f32 -1.442695, %v993_v1 }
 0x1e4   :  { %v1069_v43 = vpop.f32.mrb[10].mxu1  ;;  %v1200_v25 = vadd.f32 1.0, %v2164_v10  ;;  %v997_v27 = vadd.f32 %v996_v28, %v2797_v61  ;;  %v998_v31 = vpop.f32.mrb[11].mxu0  ;;  %2177 = vrcp.f32 %v1199_v21 }
 0x1e5   :  { %v1071_v35 = vpop.f32.mrb[11].mxu1  ;;  %v1899_v33 = vmul.f32 -1.442695, %v995_v29  ;;  %v1249_v37 = vmax.f32 %v2851_v14, %v2855_v2  ;;  %v2861_v34 = vadd.f32 %v1069_v43, %v2800_v17  ;;  %v999_v12 = vadd.f32 %v998_v31, %v2804_v18 }
 0x1e6   :  { %2179 = vrcp.f32 %v1200_v25  ;;  %v1900_v38 = vmul.f32 -1.442695, %v997_v27  ;;  %v2865_v11 = vadd.f32 %v1071_v35, %v2807_v20  ;;  %v2891_v27 = vld [vmem:[#allocation3] sm:$0xff] }
 0x1e7   :  { %2181 = vpow2.f32 %v1898_v16  ;;  %v2166_v40 = vpop.eup %2165  ;;  %v1901_v41 = vmul.f32 -1.442695, %v999_v12  ;;  %v2889_v16 = vrot.slane %v2792_v53, %v260_v51 }
 0x1e8   :  { %2183 = vpow2.f32 %v1899_v33  ;;  %v2168_v49 = vpop.eup %2167  ;;  %v1201_v47 = vadd.f32 1.0, %v2166_v40  ;;  %v1002_v50 = vpop.f32.mrb[12].mxu0 }
 0x1e9   :  { %2185 = vpow2.f32 %v1900_v38  ;;  %v1075_v19 = vpop.f32.mrb[12].mxu1  ;;  %v2170_v15 = vpop.eup %2169  ;;  %v1202_v52 = vadd.f32 1.0, %v2168_v49  ;;  %v1003_v26 = vadd.f32 %v1002_v50, %v2797_v61  ;;  %v2903_v38 = vld [vmem:[#allocation3 + $0x8] sm:$0xff] }
 0x1ea   :  { %2187 = vpow2.f32 %v1901_v41  ;;  %v2872_v57 = vadd.f32 %v1075_v19, %v2800_v17  ;;  %v1004_v58 = vpop.f32.mrb[13].mxu0  ;;  %v1077_v59 = vpop.f32.mrb[13].mxu1  ;;  %v1203_v30 = vadd.f32 1.0, %v2170_v15  ;;  %v2910_v49 = vld [vmem:[#allocation6 + $0x8] sm:$0xff] }
 0x1eb   :  { %v2172_v54 = vpop.eup %2171  ;;  %2189 = vrcp.f32 %v1201_v47  ;;  %v1005_v0 = vadd.f32 %v1004_v58, %v2804_v18  ;;  %v2876_v3 = vadd.f32 %v1077_v59, %v2807_v20  ;;  %v1006_v4 = vpop.f32.mrb[14].mxu0  ;;  %v1902_v7 = vmul.f32 -1.442695, %v1003_v26 }
 0x1ec   :  { %v1079_v36 = vpop.f32.mrb[14].mxu1  ;;  %2191 = vrcp.f32 %v1202_v52  ;;  %v1204_v5 = vadd.f32 1.0, %v2172_v54  ;;  %v1007_v8 = vadd.f32 %v1006_v4, %v2797_v61  ;;  %v1008_v62 = vpop.f32.mrb[15].mxu0 }
 0x1ed   :  { %v1081_v1 = vpop.f32.mrb[15].mxu1  ;;  %v2174_v23 = vpop.eup %2173  ;;  %2193 = vrcp.f32 %v1203_v30  ;;  %v1903_v9 = vmul.f32 -1.442695, %v1005_v0  ;;  %v2882_v21 = vadd.f32 %v1079_v36, %v2800_v17  ;;  %v1009_v43 = vadd.f32 %v1008_v62, %v2804_v18  ;;  %v2896_v17 = vld [vmem:[#allocation6] sm:$0xff] }
 0x1ee   :  { %v2176_v29 = vpop.eup %2175  ;;  %2195 = vrcp.f32 %v1204_v5  ;;  %v1904_v28 = vmul.f32 -1.442695, %v1007_v8  ;;  %v2886_v25 = vadd.f32 %v1081_v1, %v2807_v20  ;;  %v2894_v31 = vmul.f32 %v2891_v27, %v2174_v23 }
 0x1ef   :  { %v2178_v61 = vpop.eup %2177  ;;  %2197 = vpow2.f32 %v1902_v7  ;;  %v2899_v35 = vmul.f32 %v2896_v17, %v2176_v29  ;;  %v1905_v18 = vmul.f32 -1.442695, %v1009_v43 }
 0x1f0   :  { %v2180_v33 = vpop.eup %2179  ;;  %2199 = vpow2.f32 %v1903_v9  ;;  %v2906_v53 = vmul.f32 %v2903_v38, %v2178_v61  ;;  %v1938_v40 = vpop.f32.mrb[16].mxu0  ;;  %v1389_v50 = vmul.f32 %v2894_v31, %v2894_v31 }
 0x1f1   :  { %v2182_v12 = vpop.eup %2181  ;;  %2201 = vpow2.f32 %v1904_v28  ;;  %v1365_v41 = vadd.f32 %v2899_v35, %v2894_v31  ;;  %v2913_v47 = vmul.f32 %v2910_v49, %v2180_v33  ;;  %v1939_v15 = vpop.f32.mrb[17].mxu0  ;;  %v1390_v52 = vmul.f32 %v2899_v35, %v2899_v35  ;;  %v2926_v28 = vld [vmem:[#allocation3 + $0x10] sm:$0xff] }
 0x1f2   :  { %v2184_v19 = vpop.eup %2183  ;;  %v1205_v51 = vadd.f32 1.0, %v2182_v12  ;;  %2203 = vpow2.f32 %v1905_v18  ;;  %v1391_v26 = vmul.f32 %v2906_v53, %v2906_v53  ;;  %v1940_v54 = vadd.f32 %v1939_v15, %v1938_v40  ;;  %v1941_v30 = vpop.f32.mrb[18].mxu0  ;;  %v2935_v40 = vld [vmem:[#allocation6 + $0x10] sm:$0xff] }
 0x1f3   :  { %v2186_v58 = vpop.eup %2185  ;;  %v1206_v59 = vadd.f32 1.0, %v2184_v19  ;;  %1366 = vadd.xlane.f32.xlu0 %v1365_v41  ;;  %v1368_v0 = vadd.f32 %v2913_v47, %v2906_v53  ;;  %v1392_v4 = vmul.f32 %v2913_v47, %v2913_v47  ;;  %v1942_v7 = vpop.f32.mrb[19].mxu0  ;;  %v1405_v8 = vadd.f32 %v1390_v52, %v1389_v50  ;;  %v2940_v19 = vld [vmem:[#allocation3 + $0x18] sm:$0xff] }
 0x1f4   :  { %v2188_v36 = vpop.eup %2187  ;;  %2205 = vrcp.f32 %v1205_v51  ;;  %v1207_v5 = vadd.f32 1.0, %v2186_v58  ;;  %v1119_v23 = vadd.f32 %v1940_v54, %v2889_v16  ;;  %v1943_v9 = vadd.f32 %v1942_v7, %v1941_v30 }
 0x1f5   :  { %v2190_v62 = vpop.eup %2189  ;;  %2207 = vrcp.f32 %v1206_v59  ;;  %v1208_v1 = vadd.f32 1.0, %v2188_v36  ;;  %1369 = vadd.xlane.f32.xlu1 %v1368_v0  ;;  %v1408_v12 = vadd.f32 %v1392_v4, %v1391_v26 }
 0x1f6   :  { %v2192_v29 = vpop.eup %2191  ;;  %2209 = vrcp.f32 %v1207_v5  ;;  %v2929_v43 = vmul.f32 %v2926_v28, %v2190_v62  ;;  %v1253_v33 = vmax.f32 %v1245_v56, %v1119_v23  ;;  %v1122_v18 = vadd.f32 %v1943_v9, %v2889_v16  ;;  %v2954_v5 = vld [vmem:[#allocation6 + $0x18] sm:$0xff] }
 0x1f7   :  { %v2194_v61 = vpop.eup %2193  ;;  %1406 = vadd.xlane.f32.xlu0 %v1405_v8  ;;  %v2938_v41 = vmul.f32 %v2935_v40, %v2192_v29  ;;  %2211 = vrcp.f32 %v1208_v1 }
 0x1f8   :  { %v2196_v50 = vpop.eup %2195  ;;  %v2943_v51 = vmul.f32 %v2940_v19, %v2194_v61  ;;  %v1393_v15 = vmul.f32 %v2929_v43, %v2929_v43  ;;  %v1261_v52 = vsub.f32 %v2811_v24, %v1253_v33  ;;  %v1285_v26 = vsub.f32 %v2815_v6, %v1253_v33  ;;  %v1944_v54 = vpop.f32.mrb[20].mxu0 }
 0x1f9   :  { %v2198_v56 = vpop.eup %2197  ;;  %v1309_v58 = vsub.f32 %v1119_v23, %v1253_v33  ;;  %v1254_v59 = vmax.f32 %v1246_v22, %v1122_v18  ;;  %1409 = vadd.xlane.f32.xlu1 %v1408_v12  ;;  %v1945_v4 = vpop.f32.mrb[21].mxu0  ;;  %v1371_v36 = vadd.f32 %v2938_v41, %v2929_v43  ;;  %v2957_v7 = vmul.f32 %v2954_v5, %v2196_v50 }
 0x1fa   :  { %v2200_v30 = vpop.eup %2199  ;;  %v1209_v0 = vadd.f32 1.0, %v2198_v56  ;;  %v1394_v24 = vmul.f32 %v2938_v41, %v2938_v41  ;;  %v1269_v62 = vmul.f32 1.442695, %v1261_v52  ;;  %v1293_v22 = vmul.f32 1.442695, %v1285_v26  ;;  %v1947_v23 = vpop.f32.mrb[22].mxu0 }
 0x1fb   :  { %v2202_v6 = vpop.eup %2201  ;;  %v1210_v8 = vadd.f32 1.0, %v2200_v30  ;;  %v1262_v1 = vsub.f32 %v2819_v32, %v1254_v59  ;;  %v1317_v61 = vmul.f32 1.442695, %v1309_v58  ;;  %v1286_v33 = vsub.f32 %v2825_v39, %v1254_v59  ;;  %1372 = vadd.xlane.f32.xlu0 %v1371_v36  ;;  %v1948_v12 = vpop.f32.mrb[23].mxu0 }
 0x1fc   :  { %v2204_v9 = vpop.eup %2203  ;;  %2213 = vrcp.f32 %v1209_v0  ;;  %v1211_v29 = vadd.f32 1.0, %v2202_v6  ;;  %v1310_v20 = vsub.f32 %v1122_v18, %v1254_v59  ;;  %v1946_v52 = vadd.f32 %v1945_v4, %v1944_v54  ;;  %v2971_v54 = vld [vmem:[#allocation3 + $0x20] sm:$0xff] }
 0x1fd   :  { %2215 = vrcp.f32 %v1210_v8  ;;  %v1212_v50 = vadd.f32 1.0, %v2204_v9  ;;  %v1271_v56 = vmul.f32 1.442695, %v1262_v1  ;;  %v1295_v30 = vmul.f32 1.442695, %v1286_v33  ;;  %v2976_v4 = vld [vmem:[#allocation6 + $0x20] sm:$0xff] }
 0x1fe   :  { %v2206_v10 = vpop.eup %2205  ;;  %2217 = vrcp.f32 %v1211_v29  ;;  %v1949_v26 = vadd.f32 %v1948_v12, %v1947_v23  ;;  %v1319_v32 = vmul.f32 1.442695, %v1310_v20  ;;  %v1374_v0 = vadd.f32 %v2957_v7, %v2943_v51  ;;  %v2987_v23 = vld [vmem:[#allocation3 + $0x28] sm:$0xff]  ;;  %v2126_v33 = vld [vmem:[#allocation9] sm:$0xff]  }
 0x1ff   :  { %v2208_v42 = vpop.eup %2207  ;;  %2219 = vrcp.f32 %v1212_v50  ;;  %v1411_v58 = vadd.f32 %v1394_v24, %v1393_v15  ;;  %v1127_v39 = vadd.f32 %v1946_v52, %v2889_v16  ;;  %v1395_v18 = vmul.f32 %v2943_v51, %v2943_v51  ;;  %1963 = vmatpush3.bf16.msra.mxu1 %v2126_v33 }
 0x200   :  { %v2210_v6 = vpop.eup %2209  ;;  %2221 = vpow2.f32 %v1269_v62  ;;  %v1130_v36 = vadd.f32 %v1949_v26, %v2889_v16  ;;  %1375 = vadd.xlane.f32.xlu1 %v1374_v0  ;;  %v1396_v59 = vmul.f32 %v2957_v7, %v2957_v7  ;;  %v1950_v20 = vpop.f32.mrb[24].mxu0  ;;  %v2974_v15 = vmul.f32 %v2971_v54, %v2206_v10  ;;  %v2127_v0 = vld [vmem:[#allocation9 + $0x48] sm:$0xff]  }
 0x201   :  { %2223 = vpow2.f32 %v1293_v22  ;;  %1412 = vadd.xlane.f32.xlu0 %v1411_v58  ;;  %v2979_v24 = vmul.f32 %v2976_v4, %v2208_v42  ;;  %v2212_v8 = vpop.eup %2211  ;;  %v1255_v62 = vmax.f32 %v1247_v55, %v1127_v39  ;;  %v1951_v1 = vpop.f32.mrb[25].mxu0  ;;  %v2990_v10 = vmul.f32 %v2987_v23, %v2210_v6  ;;  %1964 = vmatprep.subr.bf16.mxu1 %v2127_v0 }
 0x202   :  { %2225 = vpow2.f32 %v1317_v61  ;;  %v1256_v22 = vmax.f32 %v1248_v63, %v1130_v36  ;;  %v1414_v9 = vadd.f32 %v1396_v59, %v1395_v18  ;;  %v1952_v42 = vadd.f32 %v1951_v1, %v1950_v20  ;;  %v1953_v61 = vpop.f32.mrb[26].mxu0 }
 0x203   :  { %2227 = vpow2.f32 %v1271_v56  ;;  %v1377_v29 = vadd.f32 %v2979_v24, %v2974_v15  ;;  %v1263_v55 = vsub.f32 %v2831_v44, %v1255_v62  ;;  %v1287_v12 = vsub.f32 %v2835_v48, %v1255_v62  ;;  %v1954_v50 = vpop.f32.mrb[27].mxu0 }
 0x204   :  { %2229 = vpow2.f32 %v1295_v30  ;;  %v1311_v63 = vsub.f32 %v1127_v39, %v1255_v62  ;;  %v1264_v52 = vsub.f32 %v2839_v13, %v1256_v22  ;;  %v1288_v26 = vsub.f32 %v2845_v60, %v1256_v22  ;;  %1415 = vadd.xlane.f32.xlu1 %v1414_v9 }
 0x205   :  { %2231 = vpow2.f32 %v1319_v32  ;;  %v1312_v56 = vsub.f32 %v1130_v36, %v1256_v22  ;;  %1378 = vadd.xlane.f32.xlu0 %v1377_v29  ;;  %v1273_v6 = vmul.f32 1.442695, %v1263_v55  ;;  %v1297_v18 = vmul.f32 1.442695, %v1287_v12  ;;  %v3006_v36 = vld [vmem:[#allocation6 + $0x28] sm:$0xff] }
 0x206   :  { %v2998_v58 = vpop.eup %2213  ;;  %v1321_v30 = vmul.f32 1.442695, %v1311_v63  ;;  %v1135_v44 = vadd.f32 %v1952_v42, %v2889_v16  ;;  %v1275_v39 = vmul.f32 1.442695, %v1264_v52  ;;  %v1299_v59 = vmul.f32 1.442695, %v1288_v26 }
 0x207   :  { %v2216_v48 = vpop.eup %2215  ;;  %v1323_v32 = vmul.f32 1.442695, %v1312_v56  ;;  %v1955_v20 = vadd.f32 %v1954_v50, %v1953_v61  ;;  %2233 = vpow2.f32 %v1273_v6  ;;  %v3009_v62 = vmul.f32 %v3006_v36, %v2212_v8 }
 0x208   :  { %v3001_v13 = vpop.eup %2217  ;;  %v1257_v60 = vmax.f32 %v1249_v37, %v1135_v44  ;;  %v1397_v22 = vmul.f32 %v2974_v15, %v2974_v15  ;;  %2235 = vpow2.f32 %v1297_v18  ;;  %v1398_v42 = vmul.f32 %v2979_v24, %v2979_v24  ;;  %v1956_v61 = vpop.f32.mrb[28].mxu0 }
 0x209   :  { %3326 = vst [vmem:[#allocation16_spill] sm:$0xff] %v3009_v62  ;;  %v2220_v1 = vpop.eup %2219  ;;  %v1138_v9 = vadd.f32 %v1955_v20, %v2889_v16  ;;  %v1399_v29 = vmul.f32 %v2990_v10, %v2990_v10  ;;  %2237 = vpow2.f32 %v1321_v30  ;;  %v1957_v12 = vpop.f32.mrb[29].mxu0  ;;  %v3327_v50 = vmax.f32 %v2861_v34, %v2865_v11 }
 0x20a   :  { %v3018_v37 = vpop.eup %2221  ;;  %v1265_v8 = vsub.f32 %v2851_v14, %v1257_v60  ;;  %v1289_v33 = vsub.f32 %v2855_v2, %v1257_v60  ;;  %v1313_v55 = vsub.f32 %v1135_v44, %v1257_v60  ;;  %2239 = vpow2.f32 %v1275_v39  ;;  %v1959_v0 = vpop.f32.mrb[30].mxu0 }
 0x20b   :  { %v3022_v63 = vpop.eup %2223  ;;  %v1258_v52 = vmax.f32 %v3327_v50, %v1138_v9  ;;  %v1380_v26 = vadd.f32 %v3009_v62, %v2990_v10  ;;  %v1417_v56 = vadd.f32 %v1398_v42, %v1397_v22  ;;  %2241 = vpow2.f32 %v1299_v59  ;;  %v1960_v30 = vpop.f32.mrb[31].mxu0 }
 0x20c   :  { %v3029_v6 = vpop.eup %2225  ;;  %v1333_v14 = vadd.f32 %v3022_v63, %v3018_v37  ;;  %v1277_v2 = vmul.f32 1.442695, %v1265_v8  ;;  %v1301_v18 = vmul.f32 1.442695, %v1289_v33  ;;  %2243 = vpow2.f32 %v1323_v32 }
 0x20d   :  { %3328 = vst [vmem:[#allocation17_spill] sm:$0xff] %v3029_v6  ;;  %v3033_v44 = vpop.eup %2227  ;;  %v1325_v39 = vmul.f32 1.442695, %v1313_v55  ;;  %v1266_v20 = vsub.f32 %v2861_v34, %v1258_v52  ;;  %v1290_v60 = vsub.f32 %v2865_v11, %v1258_v52  ;;  %1381 = vadd.xlane.f32.xlu1 %v1380_v26  ;;  %1418 = vadd.xlane.f32.xlu0 %v1417_v56 }
 0x20e   :  { %v3037_v22 = vpop.eup %2229  ;;  %v3040_v42 = vadd.f32 %v3029_v6, %v1333_v14  ;;  %2245 = vpow2.f32 %v1277_v2  ;;  %v1314_v59 = vsub.f32 %v1138_v9, %v1258_v52  ;;  %v1400_v8 = vmul.f32 %v3009_v62, %v3009_v62  ;;  %v3051_v14 = vld [vmem:[#allocation3 + $0x30] sm:$0xff] }
 0x20f   :  { %v3044_v33 = vpop.eup %2231  ;;  %v1334_v32 = vadd.f32 %v3037_v22, %v3033_v44  ;;  %2247 = vpow2.f32 %v1301_v18  ;;  %v1279_v34 = vmul.f32 1.442695, %v1266_v20  ;;  %v1303_v11 = vmul.f32 1.442695, %v1290_v60  ;;  %v3057_v52 = vld [vmem:[#allocation6 + $0x30] sm:$0xff]  ;;  %v2128_v18 = vld [vmem:[#allocation9 + $0x8] sm:$0xff]  }
 0x210   :  { %3329 = vst [vmem:[#allocation18_spill] sm:$0xff] %v3040_v42  ;;  %3330 = vst [vmem:[#allocation19_spill] sm:$0xff] %v3044_v33  ;;  %v1327_v55 = vmul.f32 1.442695, %v1314_v59  ;;  %v1420_v50 = vadd.f32 %v1400_v8, %v1399_v29  ;;  %v1958_v26 = vadd.f32 %v1957_v12, %v1956_v61  ;;  %2249 = vpow2.f32 %v1325_v39  ;;  %v3065_v12 = vld [vmem:[#allocation3 + $0x38] sm:$0xff]  ;;  %1965 = vmatpush3.bf16.msra.mxu1 %v2128_v18 }
 0x211   :  { %v3049_v56 = vadd.f32 %v3044_v33, %v1334_v32  ;;  %v3055_v9 = vmul.f32 %v3051_v14, %v2998_v58  ;;  %v3060_v2 = vmul.f32 %v3057_v52, %v2216_v48  ;;  %v3062_v20 = vpop.eup %2233  ;;  %2251 = vpow2.f32 %v1279_v34  ;;  %v3075_v60 = vld [vmem:[#allocation6 + $0x38] sm:$0xff] }
 0x212   :  { %1421 = vadd.xlane.f32.xlu1 %v1420_v50  ;;  %v1143_v29 = vadd.f32 %v1958_v26, %v2889_v16  ;;  %v1961_v61 = vadd.f32 %v1960_v30, %v1959_v0  ;;  %v3069_v39 = vmul.f32 %v3065_v12, %v3001_v13  ;;  %v3071_v58 = vpop.eup %2235  ;;  %v3078_v59 = vmul.f32 %v3075_v60, %v2220_v1  ;;  %v2129_v50 = vld [vmem:[#allocation9 + $0x50] sm:$0xff]  }
 0x213   :  { %3331 = vst [vmem:[#allocation20_spill] sm:$0xff] %v3049_v56  ;;  %3332 = vst [vmem:[#allocation21_spill] sm:$0xff] %v3055_v9  ;;  %v1383_v48 = vadd.f32 %v3060_v2, %v3055_v9  ;;  %v1401_v8 = vmul.f32 %v3055_v9, %v3055_v9  ;;  %v3082_v0 = vpop.eup %2237  ;;  %v1335_v13 = vadd.f32 %v3071_v58, %v3062_v20  ;;  %2253 = vpow2.f32 %v1303_v11  ;;  %v2130_v11 = vld [vmem:[#allocation9 + $0x10] sm:$0xff]  }
 0x214   :  { %3333 = vst [vmem:[#allocation22_spill] sm:$0xff] %v3060_v2  ;;  %3334 = vst [vmem:[#allocation23_spill] sm:$0xff] %v3069_v39  ;;  %v3337_v30 = vmax.f32 %v2872_v57, %v2876_v3  ;;  %v1146_v34 = vadd.f32 %v1961_v61, %v2889_v16  ;;  %v2240_v26 = vpop.eup %2239  ;;  %2255 = vpow2.f32 %v1327_v55  ;;  %v1386_v1 = vadd.f32 %v3078_v59, %v3069_v39 }
 0x215   :  { %3335 = vst [vmem:[#allocation24_spill] sm:$0xff] %v3078_v59  ;;  %3336 = vst [vmem:[#allocation25_spill] sm:$0xff] %v3082_v0  ;;  %1384 = vadd.xlane.f32.xlu0 %v1383_v48  ;;  %v1402_v18 = vmul.f32 %v3060_v2, %v3060_v2  ;;  %v1403_v33 = vmul.f32 %v3069_v39, %v3069_v39  ;;  %v2242_v6 = vpop.eup %2241  ;;  %v3097_v56 = vadd.f32 %v3082_v0, %v1335_v13 }
 0x216   :  { %v1259_v32 = vmax.f32 %v3337_v30, %v1143_v29  ;;  %1966 = vmatprep.subr.bf16.mxu1 %v2129_v50  ;;  %v3101_v48 = vpop.eup %2243  ;;  %v1336_v30 = vadd.f32 %v2242_v6, %v2240_v26  ;;  %v3339_v42 = vmax.f32 %v2882_v21, %v2886_v25  ;;  %1387 = vadd.xlane.f32.xlu1 %v1386_v1  ;;  %v2133_v1 = vld [vmem:[#allocation9 + $0x60] sm:$0xff]  }
 0x217   :  { %3338 = vst [vmem:[#allocation26_spill] sm:$0xff] %v3097_v56  ;;  %v1423_v39 = vadd.f32 %v1402_v18, %v1401_v8  ;;  %v1404_v9 = vmul.f32 %v3078_v59, %v3078_v59  ;;  %1967 = vmatpush3.bf16.msra.mxu1 %v2130_v11  ;;  %v2132_v8 = vld [vmem:[#allocation9 + $0x18] sm:$0xff]  }
 0x218   :  { %v1267_v16 = vsub.f32 %v2872_v57, %v1259_v32  ;;  %v1291_v61 = vsub.f32 %v2876_v3, %v1259_v32  ;;  %v1315_v55 = vsub.f32 %v1143_v29, %v1259_v32  ;;  %v1260_v2 = vmax.f32 %v3339_v42, %v1146_v34  ;;  %v2246_v13 = vpop.eup %2245  ;;  %v2131_v42 = vld [vmem:[#allocation9 + $0x58] sm:$0xff]  }
 0x219   :  { %v2248_v3 = vpop.eup %2247  ;;  %v3109_v29 = vadd.f32 %v3101_v48, %v1336_v30  ;;  %1424 = vadd.xlane.f32.xlu0 %v1423_v39  ;;  %v1426_v59 = vadd.f32 %v1404_v9, %v1403_v33  ;;  %1968 = vmatprep.subr.bf16.mxu1 %v2131_v42  ;;  %v1719_v33 = vmul.f32 %v2903_v38, %v3033_v44 }
 0x21a   :  { %v1281_v0 = vmul.f32 1.442695, %v1267_v16  ;;  %v1305_v56 = vmul.f32 1.442695, %v1291_v61  ;;  %v1329_v57 = vmul.f32 1.442695, %v1315_v55  ;;  %v1268_v32 = vsub.f32 %v2882_v21, %v1260_v2  ;;  %v3115_v11 = vpop.eup %2249 }
 0x21b   :  { %v1292_v50 = vsub.f32 %v2886_v25, %v1260_v2  ;;  %v1316_v62 = vsub.f32 %v1146_v34, %v1260_v2  ;;  %v1337_v18 = vadd.f32 %v2248_v3, %v2246_v13  ;;  %v1718_v16 = vmul.f32 %v2891_v27, %v3018_v37  ;;  %v2252_v30 = vpop.eup %2251  ;;  %1427 = vadd.xlane.f32.xlu1 %v1426_v59  ;;  %v2134_v25 = vld [vmem:[#allocation9 + $0x20] sm:$0xff]   ;;  %v2135_v37 = vld [vmem:[#allocation9 + $0x68] sm:$0xff]  }
 0x21c   :  { %2257 = vpow2.f32 %v1281_v0  ;;  %v1283_v61 = vmul.f32 1.442695, %v1268_v32  ;;  %1969 = vmatpush3.bf16.msra.mxu1 %v2132_v8  ;;  %v1726_v2 = vmul.f32 %v2896_v17, %v3022_v63  ;;  %v1727_v9 = vmul.f32 %v2910_v49, %v3037_v22  ;;  %v2139_v32 = vld [vmem:[#allocation9 + $0x78] sm:$0xff]  }
 0x21d   :  { %v1307_v55 = vmul.f32 1.442695, %v1292_v50  ;;  %v3118_v21 = vadd.f32 %v3115_v11, %v1337_v18  ;;  %2259 = vpow2.f32 %v1305_v56  ;;  %v1331_v27 = vmul.f32 1.442695, %v1316_v62  ;;  %1970 = vmatprep.subr.bf16.mxu1 %v2133_v1  ;;  %v2254_v59 = vpop.eup %2253  ;;  %v2140_v8 = vld [vmem:[#allocation9 + $0x38] sm:$0xff]  }
 0x21e   :  { %v1720_v39 = vmul.f32 %v2926_v28, %v3062_v20  ;;  %v1728_v56 = vmul.f32 %v2935_v40, %v3071_v58  ;;  %2261 = vpow2.f32 %v1329_v57  ;;  %v3130_v0 = vadd.f32 %v1726_v2, %v1718_v16  ;;  %v3134_v62 = vpop.eup %2255  ;;  %v2137_v57 = vld [vmem:[#allocation9 + $0x70] sm:$0xff]  }
 0x21f   :  { %v1721_v17 = vmul.f32 %v2940_v19, %v2240_v26  ;;  %v1729_v38 = vmul.f32 %v2954_v5, %v2242_v6  ;;  %v1338_v63 = vadd.f32 %v2254_v59, %v2252_v30  ;;  %2263 = vpow2.f32 %v1283_v61  ;;  %v2136_v5 = vld [vmem:[#allocation9 + $0x28] sm:$0xff]  }
 0x220   :  { %v3136_v44 = vadd.f32 %v1727_v9, %v1719_v33  ;;  %v3138_v49 = vadd.f32 %v1728_v56, %v1720_v39  ;;  %2265 = vpow2.f32 %v1307_v55  ;;  %1971 = vmatpush3.bf16.msra.mxu1 %v2134_v25  ;;  %v1722_v40 = vmul.f32 %v2971_v54, %v2246_v13  ;;  %v2138_v54 = vld [vmem:[#allocation9 + $0x30] sm:$0xff]  }
 0x221   :  { %v3140_v28 = vadd.f32 %v1729_v38, %v1721_v17  ;;  %v1730_v22 = vmul.f32 %v2976_v4, %v2248_v3  ;;  %v3145_v19 = vadd.f32 %v3134_v62, %v1338_v63  ;;  %1972 = vmatprep.subr.bf16.mxu1 %v2135_v37  ;;  %v1723_v6 = vmul.f32 %v2987_v23, %v2252_v30 }
 0x222   :  { %v1731_v20 = vmul.f32 %v3006_v36, %v2254_v59  ;;  %2267 = vpow2.f32 %v1331_v27 }
 0x223   :  { %v3149_v58 = vadd.f32 %v1730_v22, %v1722_v40 }
 0x224   :  { %v3151_v34 = vadd.f32 %v1731_v20, %v1723_v6  ;;  %1973 = vmatpush3.bf16.msra.mxu1 %v2136_v5 }
 0x225   :  { %1974 = vmatprep.subr.bf16.mxu1 %v2137_v57 }
 0x226   :  { %v2258_v26 = vpop.eup %2257 }
 0x227   :  { %v1724_v4 = vmul.f32 %v3051_v14, %v2258_v26  ;;  %v2260_v13 = vpop.eup %2259 }
 0x228   :  { %v1339_v3 = vadd.f32 %v2260_v13, %v2258_v26  ;;  %v1732_v50 = vmul.f32 %v3057_v52, %v2260_v13  ;;  %v3155_v23 = vpop.eup %2261  ;;  %1975 = vmatpush3.bf16.msra.mxu1 %v2138_v54 }
 0x229   :  { %v2264_v36 = vpop.eup %2263  ;;  %1976 = vmatprep.subr.bf16.mxu1 %v2139_v32 }
 0x22a   :  { %v3158_v42 = vadd.f32 %v3155_v23, %v1339_v3  ;;  %v3160_v1 = vadd.f32 %v1732_v50, %v1724_v4  ;;  %v2266_v18 = vpop.eup %2265  ;;  %v1725_v14 = vmul.f32 %v3065_v12, %v2264_v36  ;;  %v298_v4 = vld [vmem:[%s3315_s8] sm:$0x3] }
 0x22b   :  { %v1340_v16 = vadd.f32 %v2266_v18, %v2264_v36  ;;  %v1733_v61 = vmul.f32 %v3075_v60, %v2266_v18 }
 0x22c   :  { %v3164_v55 = vpop.eup %2267  ;;  %1977 = vmatpush3.bf16.msra.mxu1 %v2140_v8 }
 0x22d   :  { %v3167_v52 = vadd.f32 %v3164_v55, %v1340_v16  ;;  %v3169_v30 = vadd.f32 %v1733_v61, %v1725_v14  ;;  %v3181_v14 = vrot.slane %v298_v4, %v2674_v46  ;;  %v3184_v16 = vrot.slane %v298_v4, %v2671_v45  ;;  %v310_v61 = vld [vmem:[%s3316_s9] sm:$0x3] }
 0x280   :  { %v1367_v25 = vpop.xlane.xlu0 %1366 }
 0x281   :  { %v1429_v2 = vmul.f32 0.00390625, %v1367_v25 }
 0x282   :  { %v1370_v33 = vpop.xlane.xlu1 %1369 }
 0x283   :  { %v1430_v27 = vmul.f32 0.00390625, %v1370_v33  ;;  %v1445_v9 = vmul.f32 %v1429_v2, %v1429_v2  ;;  %v1461_v36 = vsub.f32 %v2894_v31, %v1429_v2  ;;  %v1462_v8 = vsub.f32 %v2899_v35, %v1429_v2 }
 0x284   :  { %v1407_v37 = vpop.xlane.xlu0 %1406 }
 0x285   :  { %v1437_v39 = vmul.f32 0.00390625, %v1407_v37  ;;  %v1446_v59 = vmul.f32 %v1430_v27, %v1430_v27  ;;  %v1463_v37 = vsub.f32 %v2906_v53, %v1430_v27  ;;  %v1464_v31 = vsub.f32 %v2913_v47, %v1430_v27 }
 0x286   :  { %v1410_v56 = vpop.xlane.xlu1 %1409 }
 0x287   :  { %v1453_v12 = vsub.f32 %v1437_v39, %v1445_v9  ;;  %v1438_v17 = vmul.f32 0.00390625, %v1410_v56 }
 0x288   :  { %v1373_v63 = vpop.xlane.xlu0 %1372 }
 0x289   :  { %v1477_v60 = vadd.f32 1e-05, %v1453_v12  ;;  %v1454_v38 = vsub.f32 %v1438_v17, %v1446_v59  ;;  %v1431_v22 = vmul.f32 0.00390625, %v1373_v63  ;;  %v3194_v12 = vrot.slane %v310_v61, %v2674_v46 }
 0x28a   :  { %v3197_v59 = vrot.slane %v310_v61, %v2671_v45 }
 0x28b   :  { %2269 = vrsqrt.f32 %v1477_v60  ;;  %v1478_v40 = vadd.f32 1e-05, %v1454_v38  ;;  %v1447_v26 = vmul.f32 %v1431_v22, %v1431_v22 }
 0x28d   :  { %2271 = vrsqrt.f32 %v1478_v40  ;;  %v1376_v5 = vpop.xlane.xlu1 %1375 }
 0x28e   :  { %v1413_v6 = vpop.xlane.xlu0 %1412  ;;  %v3171_v20 = vmul.f32 0.00390625, %v1376_v5 }
 0x28f   :  { %v1439_v57 = vmul.f32 0.00390625, %v1413_v6 }
 0x290   :  { %v1448_v32 = vmul.f32 %v3171_v20, %v3171_v20 }
 0x291   :  { %v1455_v54 = vsub.f32 %v1439_v57, %v1447_v26  ;;  %v1416_v13 = vpop.xlane.xlu1 %1415 }
 0x292   :  { %v1440_v50 = vmul.f32 0.00390625, %v1416_v13  ;;  %v1379_v18 = vpop.xlane.xlu0 %1378  ;;  %v1465_v13 = vsub.f32 %v2929_v43, %v1431_v22  ;;  %v1468_v43 = vsub.f32 %v2957_v7, %v3171_v20 }
 0x293   :  { %v1479_v3 = vadd.f32 1e-05, %v1455_v54  ;;  %v3191_v56 = vmul.f32 0.00390625, %v1379_v18 }
 0x294   :  { %v1456_v33 = vsub.f32 %v1440_v50, %v1448_v32 }
 0x295   :  { %v2270_v25 = vpop.eup %2269  ;;  %2273 = vrsqrt.f32 %v1479_v3  ;;  %v1449_v46 = vmul.f32 %v3191_v56, %v3191_v56  ;;  %v1466_v3 = vsub.f32 %v2938_v41, %v1431_v22 }
 0x296   :  { %v1493_v9 = vmul.f32 %v2270_v25, %v1461_v36  ;;  %v1494_v35 = vmul.f32 %v2270_v25, %v1462_v8  ;;  %v1480_v39 = vadd.f32 1e-05, %v1456_v33 }
 0x297   :  { %v2272_v2 = vpop.eup %2271 }
 0x298   :  { %v1495_v17 = vmul.f32 %v2272_v2, %v1463_v37  ;;  %v1496_v60 = vmul.f32 %v2272_v2, %v1464_v31  ;;  %v1510_v38 = vmul.f32 %v1494_v35, %v3184_v16  ;;  %v1509_v53 = vmul.f32 %v1493_v9, %v3181_v14 }
 0x299   :  { %2275 = vrsqrt.f32 %v1480_v39  ;;  %v1467_v31 = vsub.f32 %v2943_v51, %v3171_v20 }
 0x29a   :  { %v1382_v47 = vpop.xlane.xlu1 %1381  ;;  %v1419_v27 = vpop.xlane.xlu0 %1418  ;;  %v1512_v63 = vmul.f32 %v1496_v60, %v3184_v16  ;;  %v1511_v40 = vmul.f32 %v1495_v17, %v3181_v14  ;;  %v1526_v45 = vadd.f32 %v1510_v38, %v3197_v59  ;;  %v1525_v57 = vadd.f32 %v1509_v53, %v3194_v12 }
 0x29b   :  { %v1441_v5 = vmul.f32 0.00390625, %v1419_v27  ;;  %v3206_v6 = vmul.f32 0.00390625, %v1382_v47 }
 0x29c   :  { %v1528_v26 = vadd.f32 %v1512_v63, %v3197_v59  ;;  %v1527_v54 = vadd.f32 %v1511_v40, %v3194_v12 }
 0x29d   :  { %v1457_v4 = vsub.f32 %v1441_v5, %v1449_v46  ;;  %v1450_v61 = vmul.f32 %v3206_v6, %v3206_v6 }
 0x29e   :  { %v1542_v32 = vpack.c.bf16 %v1528_v26, %v1526_v45  ;;  %v1541_v50 = vpack.c.bf16 %v1527_v54, %v1525_v57 }
 0x29f   :  { %v2274_v36 = vpop.eup %2273  ;;  %v1481_v8 = vadd.f32 1e-05, %v1457_v4  ;;  %v1422_v18 = vpop.xlane.xlu1 %1421 }
 0x2a0   :  { %v1442_v25 = vmul.f32 0.00390625, %v1422_v18  ;;  %1677 = vmatprep.mubr.bf16.mxu1 %v1542_v32  ;;  %v1498_v33 = vmul.f32 %v2274_v36, %v1466_v3  ;;  %v1497_v37 = vmul.f32 %v2274_v36, %v1465_v13  ;;  %v1470_v36 = vsub.f32 %v2979_v24, %v3191_v56 }
 0x2a1   :  { %2277 = vrsqrt.f32 %v1481_v8  ;;  %1678 = vmatmul.mubr.bf16.vlgmr.msra.gmra.mrb[16].mxu1 %v1541_v50  ;;  %v1469_v50 = vsub.f32 %v2974_v15, %v3191_v56 }
 0x2a2   :  { %v1458_v41 = vsub.f32 %v1442_v25, %v1450_v61  ;;  %v1385_v22 = vpop.xlane.xlu0 %1384  ;;  %v1514_v2 = vmul.f32 %v1498_v33, %v3184_v16  ;;  %v1513_v53 = vmul.f32 %v1497_v37, %v3181_v14  ;;  %v1471_v37 = vsub.f32 %v2990_v10, %v3206_v6 }
 0x2a3   :  { %v2276_v9 = vpop.eup %2275  ;;  %v1435_v35 = vmul.f32 0.00390625, %v1385_v22  ;;  %v1388_v17 = vpop.xlane.xlu1 %1387 }
 0x2a4   :  { %v1482_v39 = vadd.f32 1e-05, %v1458_v41  ;;  %v1500_v60 = vmul.f32 %v2276_v9, %v1468_v43  ;;  %v1499_v38 = vmul.f32 %v2276_v9, %v1467_v31  ;;  %v1436_v47 = vmul.f32 0.00390625, %v1388_v17  ;;  %v3340_v31 = vld [vmem:[#allocation16_spill] sm:$0xff] }
 0x2a5   :  { %v1451_v7 = vmul.f32 %v1435_v35, %v1435_v35  ;;  %v1530_v40 = vadd.f32 %v1514_v2, %v3197_v59  ;;  %v1529_v5 = vadd.f32 %v1513_v53, %v3194_v12  ;;  %v1472_v43 = vsub.f32 %v3340_v31, %v3206_v6  ;;  %v3342_v53 = vld [vmem:[#allocation22_spill] sm:$0xff] }
 0x2a6   :  { %2279 = vrsqrt.f32 %v1482_v39  ;;  %v1425_v27 = vpop.xlane.xlu0 %1424  ;;  %v1516_v51 = vmul.f32 %v1500_v60, %v3184_v16  ;;  %v1515_v63 = vmul.f32 %v1499_v38, %v3181_v14  ;;  %v1452_v54 = vmul.f32 %v1436_v47, %v1436_v47  ;;  %v3341_v60 = vld [vmem:[#allocation21_spill] sm:$0xff] }
 0x2a7   :  { %v1443_v20 = vmul.f32 0.00390625, %v1425_v27  ;;  %v1473_v38 = vsub.f32 %v3341_v60, %v1435_v35  ;;  %v1474_v27 = vsub.f32 %v3342_v53, %v1435_v35 }
 0x2a8   :  { %v1532_v46 = vadd.f32 %v1516_v51, %v3197_v59  ;;  %v1531_v45 = vadd.f32 %v1515_v63, %v3194_v12  ;;  %v1428_v57 = vpop.xlane.xlu1 %1427 }
 0x2a9   :  { %v1459_v26 = vsub.f32 %v1443_v20, %v1451_v7  ;;  %v1444_v4 = vmul.f32 0.00390625, %v1428_v57 }
 0x2aa   :  { %v1544_v13 = vpack.c.bf16 %v1532_v46, %v1530_v40  ;;  %v1543_v3 = vpack.c.bf16 %v1531_v45, %v1529_v5  ;;  %v3343_v46 = vld [vmem:[#allocation23_spill] sm:$0xff]  ;;  %v3344_v45 = vld [vmem:[#allocation24_spill] sm:$0xff] }
 0x2ab   :  { %v2278_v32 = vpop.eup %2277  ;;  %v1483_v8 = vadd.f32 1e-05, %v1459_v26  ;;  %v1460_v18 = vsub.f32 %v1444_v4, %v1452_v54  ;;  %v1475_v5 = vsub.f32 %v3343_v46, %v1436_v47  ;;  %v1476_v26 = vsub.f32 %v3344_v45, %v1436_v47 }
 0x2ac   :  { %1685 = vmatprep.mubr.bf16.mxu1 %v1544_v13  ;;  %v1502_v61 = vmul.f32 %v2278_v32, %v1470_v36  ;;  %v1501_v25 = vmul.f32 %v2278_v32, %v1469_v50 }
 0x2ad   :  { %2281 = vrsqrt.f32 %v1483_v8  ;;  %1686 = vmatmul.mubr.bf16.gmra.mrb[20].mxu1 %v1543_v3  ;;  %v1484_v33 = vadd.f32 1e-05, %v1460_v18 }
 0x2ae   :  { %v1518_v22 = vmul.f32 %v1502_v61, %v3184_v16  ;;  %v1517_v56 = vmul.f32 %v1501_v25, %v3181_v14 }
 0x2af   :  { %2283 = vrsqrt.f32 %v1484_v33  ;;  %v3258_v33 = vld [vmem:[%s3312_s5] ss:$0 sm:$0xff]  ;;  %s2461_s5 = smov [#allocation11]  }
 0x2b0   :  { %v2280_v41 = vpop.eup %2279  ;;  %v1534_v39 = vadd.f32 %v1518_v22, %v3197_v59  ;;  %v1533_v10 = vadd.f32 %v1517_v56, %v3194_v12  ;;  %s1795_s12 = sshll.u32 %s2461_s5, 4  ;;  %s1796_s12 = int_to_ptr.vmem [resolvable:$true] %s1795_s12 }
 0x2b1   :  { %v1504_v15 = vmul.f32 %v2280_v41, %v1472_v43  ;;  %v1503_v24 = vmul.f32 %v2280_v41, %v1471_v37  ;;  %v3345_v41 = vld [vmem:[#allocation18_spill] sm:$0xff]  ;;  %s2421_s13 = scalar_lea.vmem %s1796_s12, 1024  ;;  %p2426_p5 = scmp.lt.s32.totalorder %s1796_s12, %s1796_s12 }
 0x2b2   :  { %p2422_p4 = scmp.ne.s32.totalorder %s1796_s12, %s2421_s13  ;;  %p2427_p6 = scmp.lt.s32.totalorder %s2421_s13, %s2421_s13 }
 0x2b3   :  { %v1520_v9 = vmul.f32 %v1504_v15, %v3184_v16  ;;  %v1519_v2 = vmul.f32 %v1503_v24, %v3181_v14  ;;  %v3346_v15 = vld [vmem:[#allocation20_spill] sm:$0xff] }
 0x2b4   :  { %p2428_p7 = por %p2427_p6, %p2426_p5 }
 0x2b5   :  { %v1536_v17 = vadd.f32 %v1520_v9, %v3197_v59  ;;  %v1535_v6 = vadd.f32 %v1519_v2, %v3194_v12 }
 0x2b6   :  { %p2429_p8 = pnand %p2428_p7, %p2422_p4 }
 0x2b7   :  { %v2282_v51 = vpop.eup %2281  ;;  %v1546_v63 = vpack.c.bf16 %v1536_v17, %v1534_v39  ;;  %v1545_v7 = vpack.c.bf16 %v1535_v6, %v1533_v10  ;;  %v3347_v6 = vld [vmem:[#allocation17_spill] sm:$0xff] }
 0x2b8   :  { %v1506_v20 = vmul.f32 %v2282_v51, %v1474_v27  ;;  %v1505_v40 = vmul.f32 %v2282_v51, %v1473_v38  ;;  %v3348_v51 = vld [vmem:[#allocation19_spill] sm:$0xff] }
 0x2b9   :  { %1693 = vmatprep.mubr.bf16.mxu1 %v1546_v63  ;;  %v2284_v57 = vpop.eup %2283 }
 0x2ba   :  { %1694 = vmatmul.mubr.bf16.gmra.mrb[24].mxu1 %v1545_v7  ;;  %v1508_v54 = vmul.f32 %v2284_v57, %v1476_v26  ;;  %v1522_v4 = vmul.f32 %v1506_v20, %v3184_v16  ;;  %v1507_v13 = vmul.f32 %v2284_v57, %v1475_v5  ;;  %v1521_v3 = vmul.f32 %v1505_v40, %v3181_v14  ;;  %v3349_v5 = vld [vmem:[#allocation26_spill] sm:$0xff] }
 0x2bc   :  { %v1524_v35 = vmul.f32 %v1508_v54, %v3184_v16  ;;  %v1523_v32 = vmul.f32 %v1507_v13, %v3181_v14  ;;  %v1538_v50 = vadd.f32 %v1522_v4, %v3197_v59  ;;  %v1537_v8 = vadd.f32 %v1521_v3, %v3194_v12  ;;  %v3350_v3 = vld [vmem:[#allocation25_spill] sm:$0xff] }
 0x2be   :  { %v1540_v36 = vadd.f32 %v1524_v35, %v3197_v59  ;;  %v1539_v47 = vadd.f32 %v1523_v32, %v3194_v12 }
 0x2c0   :  { %v1548_v18 = vpack.c.bf16 %v1540_v36, %v1538_v50  ;;  %v1547_v61 = vpack.c.bf16 %v1539_v47, %v1537_v8 }
 0x2c2   :  { %1701 = vmatprep.mubr.bf16.mxu1 %v1548_v18 }
 0x2c3   :  { %1702 = vmatmul.mubr.bf16.gmra.mrb[28].mxu1 %v1547_v61 }
 0x374   :  { %v1978_v25 = vpop.f32.mrb[16].mxu1 }
 0x375   :  { %v1979_v16 = vpop.f32.mrb[17].mxu1 }
 0x376   :  { %v1980_v14 = vadd.f32 %v1979_v16, %v1978_v25  ;;  %v1981_v37 = vpop.f32.mrb[18].mxu1 }
 0x377   :  { %v1982_v31 = vpop.f32.mrb[19].mxu1 }
 0x378   :  { %v1680_v59 = vadd.f32 %v1980_v14, %v3258_v33  ;;  %v1983_v43 = vadd.f32 %v1982_v31, %v1981_v37 }
 0x37a   :  { %2285 = vtanh.f32 %v1680_v59  ;;  %v1683_v12 = vadd.f32 %v1983_v43, %v3258_v33 }
 0x37c   :  { %2287 = vtanh.f32 %v1683_v12 }
 0x37d   :  { %2289 = vrcp.f32 %v3345_v41 }
 0x37e   :  { %2291 = vrcp.f32 %v3346_v15 }
 0x380   :  { %v1984_v22 = vpop.f32.mrb[20].mxu1 }
 0x381   :  { %v1985_v24 = vpop.f32.mrb[21].mxu1 }
 0x382   :  { %v1986_v56 = vadd.f32 %v1985_v24, %v1984_v22  ;;  %v1987_v9 = vpop.f32.mrb[22].mxu1 }
 0x383   :  { %v1988_v2 = vpop.f32.mrb[23].mxu1 }
 0x384   :  { %v2286_v39 = vpop.eup %2285  ;;  %v1688_v17 = vadd.f32 %v1986_v56, %v3258_v33  ;;  %v1989_v10 = vadd.f32 %v1988_v2, %v1987_v9 }
 0x385   :  { %v1742_v60 = vmul.f32 %v2286_v39, %v3347_v6 }
 0x386   :  { %v2288_v38 = vpop.eup %2287  ;;  %2293 = vtanh.f32 %v1688_v17  ;;  %v1691_v53 = vadd.f32 %v1989_v10, %v3258_v33 }
 0x387   :  { %v1750_v27 = vadd.f32 %v1742_v60, %v3130_v0  ;;  %v1743_v63 = vmul.f32 %v2288_v38, %v3348_v51  ;;  %v2290_v7 = vpop.eup %2289 }
 0x388   :  { %2295 = vtanh.f32 %v1691_v53  ;;  %v2292_v46 = vpop.eup %2291 }
 0x389   :  { %v1759_v20 = vmul.f32 %v2290_v7, %v1750_v27  ;;  %v1751_v40 = vadd.f32 %v1743_v63, %v3136_v44  ;;  %2297 = vrcp.f32 %v3349_v5 }
 0x38a   :  { %2299 = vrcp.f32 %v3109_v29 }
 0x38b   :  { %1774 = vst [vmem:[#allocation11] sm:$0xff] %v1759_v20  ;;  %v1761_v45 = vmul.f32 %v2292_v46, %v1751_v40 }
 0x38d   :  { %1775 = vst [vmem:[#allocation11 + $0x8] sm:$0xff] %v1761_v45  ;;  %v1990_v26 = vpop.f32.mrb[24].mxu1 }
 0x38e   :  { %v1991_v57 = vpop.f32.mrb[25].mxu1 }
 0x38f   :  { %v1992_v54 = vadd.f32 %v1991_v57, %v1990_v26  ;;  %v1993_v4 = vpop.f32.mrb[26].mxu1 }
 0x390   :  { %v2294_v0 = vpop.eup %2293  ;;  %v1994_v13 = vpop.f32.mrb[27].mxu1 }
 0x391   :  { %v1744_v35 = vmul.f32 %v2294_v0, %v3350_v3  ;;  %v1696_v32 = vadd.f32 %v1992_v54, %v3258_v33  ;;  %v1995_v50 = vadd.f32 %v1994_v13, %v1993_v4 }
 0x392   :  { %v2296_v44 = vpop.eup %2295 }
 0x393   :  { %v1752_v36 = vadd.f32 %v1744_v35, %v3138_v49  ;;  %v1745_v8 = vmul.f32 %v2296_v44, %v3101_v48  ;;  %2301 = vtanh.f32 %v1696_v32  ;;  %v1699_v29 = vadd.f32 %v1995_v50, %v3258_v33  ;;  %v2298_v47 = vpop.eup %2297 }
 0x394   :  { %v2300_v25 = vpop.eup %2299 }
 0x395   :  { %v1763_v18 = vmul.f32 %v2298_v47, %v1752_v36  ;;  %v1753_v61 = vadd.f32 %v1745_v8, %v3140_v28  ;;  %2303 = vtanh.f32 %v1699_v29 }
 0x396   :  { %2305 = vrcp.f32 %v3118_v21  ;;  %v1996_v14 = vpop.f32.mrb[28].mxu1 }
 0x397   :  { %1776 = vst [vmem:[#allocation11 + $0x10] sm:$0xff] %v1763_v18  ;;  %v1765_v16 = vmul.f32 %v2300_v25, %v1753_v61  ;;  %v1997_v37 = vpop.f32.mrb[29].mxu1  ;;  %2307 = vrcp.f32 %v3145_v19 }
 0x398   :  { %v1998_v49 = vadd.f32 %v1997_v37, %v1996_v14  ;;  %v1999_v48 = vpop.f32.mrb[30].mxu1 }
 0x399   :  { %1777 = vst [vmem:[#allocation11 + $0x18] sm:$0xff] %v1765_v16  ;;  %v2000_v31 = vpop.f32.mrb[31].mxu1 }
 0x39a   :  { %v1704_v59 = vadd.f32 %v1998_v49, %v3258_v33  ;;  %v2001_v43 = vadd.f32 %v2000_v31, %v1999_v48 }
 0x39c   :  { %2309 = vtanh.f32 %v1704_v59  ;;  %v1707_v28 = vadd.f32 %v2001_v43, %v3258_v33 }
 0x39d   :  { %v2302_v12 = vpop.eup %2301 }
 0x39e   :  { %v1746_v41 = vmul.f32 %v2302_v12, %v3115_v11  ;;  %2311 = vtanh.f32 %v1707_v28 }
 0x39f   :  { %v2304_v21 = vpop.eup %2303  ;;  %2313 = vrcp.f32 %v3158_v42 }
 0x3a0   :  { %v1754_v15 = vadd.f32 %v1746_v41, %v3149_v58  ;;  %v1747_v22 = vmul.f32 %v2304_v21, %v3134_v62  ;;  %v2306_v19 = vpop.eup %2305  ;;  %2315 = vrcp.f32 %v3167_v52 }
 0x3a1   :  { %v2308_v9 = vpop.eup %2307 }
 0x3a2   :  { %v1767_v24 = vmul.f32 %v2306_v19, %v1754_v15  ;;  %v1755_v56 = vadd.f32 %v1747_v22, %v3151_v34 }
 0x3a4   :  { %1778 = vst [vmem:[#allocation11 + $0x20] sm:$0xff] %v1767_v24  ;;  %v1769_v2 = vmul.f32 %v2308_v9, %v1755_v56 }
 0x3a6   :  { %1779 = vst [vmem:[#allocation11 + $0x28] sm:$0xff] %v1769_v2  ;;  %v2310_v33 = vpop.eup %2309 }
 0x3a7   :  { %v1748_v11 = vmul.f32 %v2310_v33, %v3155_v23 }
 0x3a8   :  { %v2312_v39 = vpop.eup %2311 }
 0x3a9   :  { %v1756_v58 = vadd.f32 %v1748_v11, %v3160_v1  ;;  %v1749_v62 = vmul.f32 %v2312_v39, %v3164_v55  ;;  %v2314_v17 = vpop.eup %2313 }
 0x3aa   :  { %v2316_v10 = vpop.eup %2315 }
 0x3ab   :  { %v1771_v42 = vmul.f32 %v2314_v17, %v1756_v58  ;;  %v1757_v34 = vadd.f32 %v1749_v62, %v3169_v30 }
 0x3ad   :  { %1780 = vst [vmem:[#allocation11 + $0x30] sm:$0xff] %v1771_v42  ;;  %v1773_v52 = vmul.f32 %v2316_v10, %v1757_v34 }
 0x3af   :  { %1781 = vst [vmem:[#allocation11 + $0x38] sm:$0xff] %v1773_v52 }
 0x3b0   :  { %2432 = shalt.err (!%p2429_p8)
}
 0x3b1   :  { %s2433_s18 = scalar_lea.hbm %s3317_s10, 1024 }
 0x3b2   :  { %p2434_p9 = scmp.ne.s32.totalorder %s3317_s10, %s2433_s18  ;;  %p2437_p10 = scmp.lt.u32.totalorder %s2433_s18, %s3317_s10 }
 0x3b4   :  { %p2439_p11 = pnand %p2437_p10, %p2434_p9 }
 0x3b6   :  { %2442 = shalt.err (!%p2439_p11)
}
 0x3b7   :  { %1801 = dma.vmem_to_hbm [thread:$0]  %s1796_s12, 1024, %s3317_s10, [#allocation5], %s2453_s25, %s2453_s25, %s2454_s26  }
 0x3b8   :  { %2449 = dma.done.wait [#allocation5], 1024  }
 0x3b9   :  { %2450 = vsyncadd [#allocation5], 4294966272 }
 0x3ba   :  { %1805 = vsyncpa [#allocation4], 1 }
 0x3bb   :  { %1806 = vsyncpa [#allocation7], 1 }
 0x3bc   :  { %1807 = vsyncpa [#allocation10], 1 }
 0x3bd   :  { %1808 = vsyncpa [#allocation5], 1 }

</bundles_post_ra>
